<compile_context>
chip_gen: v6e
topology: v6e:2x2x1
jax: 0.10.0
libtpu: 0.0.40
codegen_flags: <defaults>
</compile_context>

<pallas_src>
import math
from functools import partial

import jax
import jax.numpy as jnp
from jax.experimental import pallas as pl
from jax.experimental.pallas import tpu as pltpu


# ----------------------------------------------------------------------------
# Kernel 1: one LightGCN layer  h_out = norm_adj @ h_in  (tiled bf16 matmul,
# f32 accumulation).  grid = (rows, k-reduction).
# ----------------------------------------------------------------------------
def _lg_layer_kernel(adj_ref, h_ref, out_ref, acc_ref):
    @pl.when(pl.program_id(1) == 0)
    def _():
        acc_ref[...] = jnp.zeros_like(acc_ref)

    acc_ref[...] += jnp.dot(adj_ref[...], h_ref[...],
                            preferred_element_type=jnp.float32)

    @pl.when(pl.program_id(1) == pl.num_programs(1) - 1)
    def _():
        out_ref[...] = acc_ref[...].astype(out_ref.dtype)


def _pick_tile(n, pref=512):
    """Largest tile <= pref that divides n and keeps (8,128) alignment."""
    t = min(n, pref)
    while t >= 128 and n % t:
        t -= 128
    if t < 128 or n % t:
        t = n  # fall back to the full extent (always legal)
    return t


def lightgcn_layer(norm_adj_bf16, h_bf16, *, tm, tk):
    """norm_adj_bf16: [N, N] bf16, h_bf16: [N, Dt] bf16  ->  [N, Dt] f32."""
    N, _ = norm_adj_bf16.shape
    Dt = h_bf16.shape[1]
    return pl.pallas_call(
        _lg_layer_kernel,
        out_shape=jax.ShapeDtypeStruct((N, Dt), jnp.float32),
        grid_spec=pltpu.PrefetchScalarGridSpec(
            num_scalar_prefetch=0,
            grid=(N // tm, N // tk),
            in_specs=[
                pl.BlockSpec((tm, tk), lambda i, k: (i, k)),   # adjacency tile
                pl.BlockSpec((tk, Dt), lambda i, k: (k, 0)),   # h tile
            ],
            out_specs=pl.BlockSpec((tm, Dt), lambda i, k: (i, 0)),
            scratch_shapes=[pltpu.VMEM((tm, Dt), jnp.float32)],
        ),
        compiler_params=pltpu.CompilerParams(
            dimension_semantics=("parallel", "arbitrary"),
            vmem_limit_bytes=48 * 1024 * 1024,
        ),
    )(norm_adj_bf16, h_bf16)


# ----------------------------------------------------------------------------
# Kernel 2: fused DICE losses.
#   - three BPR losses from the gathered per-example embeddings,
#   - both L2 (MSE) discrepancy terms over the unique users / items
#     (uniqueness expressed as per-node usage masks).
# Output: [loss_int, loss_pop, loss_total, disc_item, disc_user] in SMEM.
# ----------------------------------------------------------------------------
def _make_loss_kernel(D):
    def kernel(u_ref, ip_ref, in_ref, mask_ref, feat_ref,
               item_used_ref, user_used_ref, out_ref):
        u = u_ref[...]            # [M, 2D]  (int in lanes :D, pop in lanes D:)
        ip = ip_ref[...]
        ineg = in_ref[...]
        mask = mask_ref[...]      # [M, 1] float32

        def log_sigmoid(x):       # stable: -softplus(-x)
            return jnp.minimum(x, 0.0) - jnp.log(1.0 + jnp.exp(-jnp.abs(x)))

        p_all = u * ip
        n_all = u * ineg
        p_int = jnp.sum(p_all[:, :D], axis=-1, keepdims=True)   # [M, 1]
        p_pop = jnp.sum(p_all[:, D:], axis=-1, keepdims=True)
        n_int = jnp.sum(n_all[:, :D], axis=-1, keepdims=True)
        n_pop = jnp.sum(n_all[:, D:], axis=-1, keepdims=True)

        m = jnp.float32(u.shape[0])
        loss_int = -jnp.sum(mask * log_sigmoid(p_int - n_int)) / m
        loss_pop = (-jnp.sum(mask * log_sigmoid(n_pop - p_pop)) / m
                    - jnp.sum((1.0 - mask) * log_sigmoid(p_pop - n_pop)) / m)
        loss_total = -jnp.sum(log_sigmoid((p_int + p_pop) - (n_int + n_pop))) / m

        # L2 discrepancy (nn.MSELoss, mean reduction) over unique nodes.
        feat = feat_ref[...]                       # [N, 2D]
        diff = feat[:, :D] - feat[:, D:]           # int - pop  [N, D]
        row_sq = jnp.sum(diff * diff, axis=-1, keepdims=True)   # [N, 1]
        item_used = item_used_ref[...]             # [N, 1] {0,1}
        user_used = user_used_ref[...]
        d_f = jnp.float32(D)
        disc_item = jnp.sum(item_used * row_sq) / (jnp.sum(item_used) * d_f)
        disc_user = jnp.sum(user_used * row_sq) / (jnp.sum(user_used) * d_f)

        out_ref[0] = loss_int
        out_ref[1] = loss_pop
        out_ref[2] = loss_total
        out_ref[3] = disc_item
        out_ref[4] = disc_user
    return kernel


def fused_losses(u, ip, ineg, mask_f, feat, item_used, user_used, D):
    return pl.pallas_call(
        _make_loss_kernel(D),
        out_shape=jax.ShapeDtypeStruct((5,), jnp.float32),
        in_specs=[pl.BlockSpec(memory_space=pltpu.MemorySpace.VMEM)] * 7,
        out_specs=pl.BlockSpec(memory_space=pltpu.MemorySpace.SMEM),
    )(u, ip, ineg, mask_f, feat, item_used, user_used)


# ----------------------------------------------------------------------------
# Jitted functional forward (no host round-trips).
# ----------------------------------------------------------------------------
@partial(jax.jit, static_argnames=("num_layers", "n_user", "emb_dim"))
def lgndice_forward(emb_int, emb_pop, norm_adj, user, item_p, item_n, mask,
                    int_weight, pop_weight, dis_pen, *,
                    num_layers, n_user, emb_dim):
    N = norm_adj.shape[0]
    D = emb_dim

    # Fuse the two tables into one lane-dense slab: [N, 2D].
    feat0 = jnp.concatenate([emb_int, emb_pop], axis=1)
    adj_bf16 = norm_adj.astype(jnp.bfloat16)

    tm = _pick_tile(N)
    tk = _pick_tile(N)

    # LightGCN propagation + layer mean (f32 accumulation in the wrapper).
    h = feat0
    acc = feat0
    for _ in range(num_layers):
        h = lightgcn_layer(adj_bf16, h.astype(jnp.bfloat16), tm=tm, tk=tk)
        # TODO(synk): F.dropout(p=dropout) runs with p=0.0 here (identity);
        # stochastic dropout masks are not reproduced.
        acc = acc + h
    feat = acc / jnp.float32(num_layers + 1)       # [N, 2D] f32

    # Gather per-example embeddings (data-dependent gather: plain-JAX glue).
    item_p = item_p + n_user
    item_n = item_n + n_user
    M = user.size
    u = jnp.take(feat, user.reshape(M), axis=0)        # [M, 2D]
    ip = jnp.take(feat, item_p.reshape(M), axis=0)
    ineg = jnp.take(feat, item_n.reshape(M), axis=0)
    mask_f = mask.astype(jnp.float32).reshape(M, 1)

    # torch.unique equivalent: per-node usage masks, built on device.
    item_idx = jnp.concatenate([item_p.reshape(M), item_n.reshape(M)])
    item_used = jnp.zeros((N, 1), jnp.float32).at[item_idx].set(1.0)
    user_used = jnp.zeros((N, 1), jnp.float32).at[user.reshape(M)].set(1.0)

    losses = fused_losses(u, ip, ineg, mask_f, feat, item_used, user_used, D)
    loss_int, loss_pop, loss_total = losses[0], losses[1], losses[2]
    discrepancy = losses[3] + losses[4]

    return (int_weight * loss_int
            + pop_weight * loss_pop
            + loss_total
            - dis_pen * discrepancy)


# ----------------------------------------------------------------------------
# Python-side model (parameter setup + glue).
# ----------------------------------------------------------------------------
class LGNDICEPallas:
    def __init__(self, num_users, num_items, embedding_size, num_layers,
                 dropout, dis_loss, dis_pen, int_weight, pop_weight, key):
        # TODO(synk): only the 'L2' (MSELoss) discrepancy criterion is
        # implemented; 'L1' / 'dcor' variants are not instantiated here.
        assert dis_loss == 'L2', "this script instantiates the L2 criterion"
        self.n_user = num_users
        self.n_item = num_items
        self.embedding_size = embedding_size
        self.num_layers = num_layers
        self.dropout = dropout
        self.dis_pen = dis_pen
        self.int_weight = int_weight
        self.pop_weight = pop_weight

        stdv = 1.0 / math.sqrt(embedding_size)
        k_int, k_pop = jax.random.split(key)
        n_total = num_users + num_items
        self.embeddings_int = jax.random.uniform(
            k_int, (n_total, embedding_size), jnp.float32, -stdv, stdv)
        self.embeddings_pop = jax.random.uniform(
            k_pop, (n_total, embedding_size), jnp.float32, -stdv, stdv)

    def forward(self, user, item_p, item_n, mask, norm_adj, training=True):
        return lgndice_forward(
            self.embeddings_int, self.embeddings_pop, norm_adj,
            user, item_p, item_n, mask,
            jnp.float32(self.int_weight), jnp.float32(self.pop_weight),
            jnp.float32(self.dis_pen),
            num_layers=self.num_layers, n_user=self.n_user,
            emb_dim=self.embedding_size)


# ----------------------------------------------------------------------------
# Deterministic synthetic bipartite graph + inputs; run once.
# ----------------------------------------------------------------------------
def build_norm_adj(key, n_user, n_item):
    N = n_user + n_item
    inter = jax.random.bernoulli(key, 0.08, (n_user, n_item)).astype(jnp.float32)
    A = jnp.zeros((N, N), jnp.float32)
    A = A.at[:n_user, n_user:].set(inter)
    A = A.at[n_user:, :n_user].set(inter.T)
    deg = jnp.clip(jnp.sum(A, axis=1), 1.0, None)     # in_degrees().clamp(min=1)
    norm = deg ** -0.5
    return norm[:, None] * A * norm[None, :]


if __name__ == "__main__":
    n_user, n_item = 64, 64
    embedding_size = 64
    num_layers = 2
    B, T = 8, 4

    key = jax.random.PRNGKey(0)
    k_graph, k_params, k_user, k_ip, k_in, k_mask = jax.random.split(key, 6)

    norm_adj = build_norm_adj(k_graph, n_user, n_item)

    model = LGNDICEPallas(
        num_users=n_user, num_items=n_item, embedding_size=embedding_size,
        num_layers=num_layers, dropout=0.0, dis_loss='L2', dis_pen=0.01,
        int_weight=0.1, pop_weight=0.1, key=k_params)

    user = jax.random.randint(k_user, (B, T), 0, n_user, dtype=jnp.int32)
    item_p = jax.random.randint(k_ip, (B, T), 0, n_item, dtype=jnp.int32)
    item_n = jax.random.randint(k_in, (B, T), 0, n_item, dtype=jnp.int32)
    mask = jax.random.bernoulli(k_mask, 0.5, (B, T))

    loss = model.forward(user, item_p, item_n, mask, norm_adj, training=True)
    loss = jax.block_until_ready(loss)
    assert jnp.isfinite(loss), "loss is not finite"
    print("KERNEL_OK")
</pallas_src>

<mosaic_0001>
module attributes {stable_mosaic.version = 11 : i64} {
  func.func @_lg_layer_kernel(%arg0: i32, %arg1: i32, %arg2: memref<128x128xbf16, #tpu.memory_space<vmem>>, %arg3: memref<128x128xbf16, #tpu.memory_space<vmem>>, %arg4: memref<128x128xf32, #tpu.memory_space<vmem>>, %arg5: memref<128x128xf32, #tpu.memory_space<vmem>>) attributes {dimension_semantics = [#tpu.dimension_semantics<parallel>, #tpu.dimension_semantics<arbitrary>], iteration_bounds = array<i64: 1, 1>, scalar_prefetch = 0 : i64, scratch_operands = 1 : i64, tpu.core_type = #tpu.core_type<tc>, window_params = [{transform_indices = @transform_0, window_bounds = array<i64: 128, 128>}, {transform_indices = @transform_1, window_bounds = array<i64: 128, 128>}, {transform_indices = @transform_2, window_bounds = array<i64: 128, 128>}]} {
    %c0_i32 = arith.constant 0 : i32
    %0 = arith.cmpi eq, %arg1, %c0_i32 : i32
    %1 = arith.extui %0 : i1 to i32
    %c0_i32_0 = arith.constant 0 : i32
    %2 = arith.cmpi ne, %1, %c0_i32_0 : i32
    scf.if %2 {
      %cst_10 = arith.constant 0.000000e+00 : f32
      %12 = vector.broadcast %cst_10 : f32 to vector<128x128xf32>
      %c0_11 = arith.constant 0 : index
      %c0_12 = arith.constant 0 : index
      %13 = vector.load %arg5[%c0_11, %c0_12] : memref<128x128xf32, #tpu.memory_space<vmem>>, vector<128x128xf32>
      tpu.vector_store %arg5[%c0_11, %c0_12], %12 {strides = array<i32>} : memref<128x128xf32, #tpu.memory_space<vmem>>, vector<128x128xf32>,
    } else {
    }
    %c0 = arith.constant 0 : index
    %c0_1 = arith.constant 0 : index
    %3 = vector.load %arg5[%c0, %c0_1] : memref<128x128xf32, #tpu.memory_space<vmem>>, vector<128x128xf32>
    %c0_2 = arith.constant 0 : index
    %c0_3 = arith.constant 0 : index
    %4 = vector.load %arg2[%c0_2, %c0_3] : memref<128x128xbf16, #tpu.memory_space<vmem>>, vector<128x128xbf16>
    %c0_4 = arith.constant 0 : index
    %c0_5 = arith.constant 0 : index
    %5 = vector.load %arg3[%c0_4, %c0_5] : memref<128x128xbf16, #tpu.memory_space<vmem>>, vector<128x128xbf16>
    %cst = arith.constant dense<0.000000e+00> : vector<128x128xf32>
    %6 = tpu.matmul %4, %5, %cst {dimension_numbers = #tpu.dot_dimension_numbers<[1], [0], [0], [1], [0, 0, 1, 1], [], []>} : vector<128x128xbf16>, vector<128x128xbf16>, vector<128x128xf32> -> vector<128x128xf32>
    %7 = arith.addf %3, %6 : vector<128x128xf32>
    %c0_6 = arith.constant 0 : index
    %c0_7 = arith.constant 0 : index
    %8 = vector.load %arg5[%c0_6, %c0_7] : memref<128x128xf32, #tpu.memory_space<vmem>>, vector<128x128xf32>
    tpu.vector_store %arg5[%c0_6, %c0_7], %7 {strides = array<i32>} : memref<128x128xf32, #tpu.memory_space<vmem>>, vector<128x128xf32>,
    %c0_i32_8 = arith.constant 0 : i32
    %9 = arith.cmpi eq, %arg1, %c0_i32_8 : i32
    %10 = arith.extui %9 : i1 to i32
    %c0_i32_9 = arith.constant 0 : i32
    %11 = arith.cmpi ne, %10, %c0_i32_9 : i32
    scf.if %11 {
      %c0_10 = arith.constant 0 : index
      %c0_11 = arith.constant 0 : index
      %12 = vector.load %arg5[%c0_10, %c0_11] : memref<128x128xf32, #tpu.memory_space<vmem>>, vector<128x128xf32>
      %c0_12 = arith.constant 0 : index
      %c0_13 = arith.constant 0 : index
      %13 = vector.load %arg4[%c0_12, %c0_13] : memref<128x128xf32, #tpu.memory_space<vmem>>, vector<128x128xf32>
      tpu.vector_store %arg4[%c0_12, %c0_13], %12 {strides = array<i32>} : memref<128x128xf32, #tpu.memory_space<vmem>>, vector<128x128xf32>,
    } else {
    }
    return
  }
  func.func @transform_0(%arg0: i32, %arg1: i32) -> (i32, i32) {
    %c0_i32 = arith.constant 0 : i32
    return %arg0, %arg1 : i32, i32
  }
  func.func @transform_1(%arg0: i32, %arg1: i32) -> (i32, i32) {
    %c0_i32 = arith.constant 0 : i32
    %c0_i32_0 = arith.constant 0 : i32
    return %arg1, %c0_i32 : i32, i32
  }
  func.func @transform_2(%arg0: i32, %arg1: i32) -> (i32, i32) {
    %c0_i32 = arith.constant 0 : i32
    %c0_i32_0 = arith.constant 0 : i32
    return %arg0, %c0_i32 : i32, i32
  }
}

module attributes {stable_mosaic.version = 11 : i64} {
  func.func @kernel(%arg0: memref<32x128xf32, #tpu.memory_space<vmem>>, %arg1: memref<32x128xf32, #tpu.memory_space<vmem>>, %arg2: memref<32x128xf32, #tpu.memory_space<vmem>>, %arg3: memref<32x1xf32, #tpu.memory_space<vmem>>, %arg4: memref<128x128xf32, #tpu.memory_space<vmem>>, %arg5: memref<128x1xf32, #tpu.memory_space<vmem>>, %arg6: memref<128x1xf32, #tpu.memory_space<vmem>>, %arg7: memref<5xf32, #tpu.memory_space<smem>>) attributes {dimension_semantics = [], scalar_prefetch = 0 : i64, scratch_operands = 0 : i64, tpu.core_type = #tpu.core_type<tc>} {
    %c0 = arith.constant 0 : index
    %c0_0 = arith.constant 0 : index
    %0 = vector.load %arg0[%c0, %c0_0] : memref<32x128xf32, #tpu.memory_space<vmem>>, vector<32x128xf32>
    %c0_1 = arith.constant 0 : index
    %c0_2 = arith.constant 0 : index
    %1 = vector.load %arg1[%c0_1, %c0_2] : memref<32x128xf32, #tpu.memory_space<vmem>>, vector<32x128xf32>
    %c0_3 = arith.constant 0 : index
    %c0_4 = arith.constant 0 : index
    %2 = vector.load %arg2[%c0_3, %c0_4] : memref<32x128xf32, #tpu.memory_space<vmem>>, vector<32x128xf32>
    %c0_5 = arith.constant 0 : index
    %c0_6 = arith.constant 0 : index
    %3 = vector.load %arg3[%c0_5, %c0_6] : memref<32x1xf32, #tpu.memory_space<vmem>>, vector<32x1xf32>
    %4 = arith.mulf %0, %1 : vector<32x128xf32>
    %5 = arith.mulf %0, %2 : vector<32x128xf32>
    %6 = vector.extract_strided_slice %4 {offsets = [0, 0], sizes = [32, 64], strides = [1, 1]} : vector<32x128xf32> to vector<32x64xf32>
    %cst = arith.constant dense<0.000000e+00> : vector<32xf32>
    %7 = vector.multi_reduction <add>, %6, %cst [1] : vector<32x64xf32> to vector<32xf32>
    %8 = vector.shape_cast %7 : vector<32xf32> to vector<32x1xf32>
    %9 = vector.extract_strided_slice %4 {offsets = [0, 64], sizes = [32, 64], strides = [1, 1]} : vector<32x128xf32> to vector<32x64xf32>
    %cst_7 = arith.constant dense<0.000000e+00> : vector<32xf32>
    %10 = vector.multi_reduction <add>, %9, %cst_7 [1] : vector<32x64xf32> to vector<32xf32>
    %11 = vector.shape_cast %10 : vector<32xf32> to vector<32x1xf32>
    %12 = vector.extract_strided_slice %5 {offsets = [0, 0], sizes = [32, 64], strides = [1, 1]} : vector<32x128xf32> to vector<32x64xf32>
    %cst_8 = arith.constant dense<0.000000e+00> : vector<32xf32>
    %13 = vector.multi_reduction <add>, %12, %cst_8 [1] : vector<32x64xf32> to vector<32xf32>
    %14 = vector.shape_cast %13 : vector<32xf32> to vector<32x1xf32>
    %15 = vector.extract_strided_slice %5 {offsets = [0, 64], sizes = [32, 64], strides = [1, 1]} : vector<32x128xf32> to vector<32x64xf32>
    %cst_9 = arith.constant dense<0.000000e+00> : vector<32xf32>
    %16 = vector.multi_reduction <add>, %15, %cst_9 [1] : vector<32x64xf32> to vector<32xf32>
    %17 = vector.shape_cast %16 : vector<32xf32> to vector<32x1xf32>
    %18 = arith.subf %8, %14 : vector<32x1xf32>
    %cst_10 = arith.constant 0.000000e+00 : f32
    %19 = vector.broadcast %cst_10 : f32 to vector<32x1xf32>
    %20 = arith.minimumf %18, %19 : vector<32x1xf32>
    %21 = math.absf %18 : vector<32x1xf32>
    %cst_11 = arith.constant 0.000000e+00 : f32
    %22 = vector.broadcast %cst_11 : f32 to vector<32x1xf32>
    %23 = arith.subf %22, %21 : vector<32x1xf32>
    %24 = math.exp %23 : vector<32x1xf32>
    %cst_12 = arith.constant 1.000000e+00 : f32
    %25 = vector.broadcast %cst_12 : f32 to vector<32x1xf32>
    %26 = arith.addf %25, %24 : vector<32x1xf32>
    %27 = math.log %26 : vector<32x1xf32>
    %28 = arith.subf %20, %27 : vector<32x1xf32>
    %29 = arith.mulf %3, %28 : vector<32x1xf32>
    %30 = vector.shape_cast %29 : vector<32x1xf32> to vector<1x32x1xf32>
    %cst_13 = arith.constant dense<0.000000e+00> : vector<1xf32>
    %31 = vector.multi_reduction <add>, %30, %cst_13 [1, 2] : vector<1x32x1xf32> to vector<1xf32>
    %32 = vector.shape_cast %31 : vector<1xf32> to vector<1x1x1xf32>
    %33 = vector.extract %32[0, 0, 0] : f32 from vector<1x1x1xf32>
    %cst_14 = arith.constant 0.000000e+00 : f32
    %34 = arith.subf %cst_14, %33 : f32
    %cst_15 = arith.constant 3.200000e+01 : f32
    %35 = arith.divf %34, %cst_15 : f32
    %36 = arith.subf %17, %11 : vector<32x1xf32>
    %cst_16 = arith.constant 0.000000e+00 : f32
    %37 = vector.broadcast %cst_16 : f32 to vector<32x1xf32>
    %38 = arith.minimumf %36, %37 : vector<32x1xf32>
    %39 = math.absf %36 : vector<32x1xf32>
    %cst_17 = arith.constant 0.000000e+00 : f32
    %40 = vector.broadcast %cst_17 : f32 to vector<32x1xf32>
    %41 = arith.subf %40, %39 : vector<32x1xf32>
    %42 = math.exp %41 : vector<32x1xf32>
    %cst_18 = arith.constant 1.000000e+00 : f32
    %43 = vector.broadcast %cst_18 : f32 to vector<32x1xf32>
    %44 = arith.addf %43, %42 : vector<32x1xf32>
    %45 = math.log %44 : vector<32x1xf32>
    %46 = arith.subf %38, %45 : vector<32x1xf32>
    %47 = arith.mulf %3, %46 : vector<32x1xf32>
    %48 = vector.shape_cast %47 : vector<32x1xf32> to vector<1x32x1xf32>
    %cst_19 = arith.constant dense<0.000000e+00> : vector<1xf32>
    %49 = vector.multi_reduction <add>, %48, %cst_19 [1, 2] : vector<1x32x1xf32> to vector<1xf32>
    %50 = vector.shape_cast %49 : vector<1xf32> to vector<1x1x1xf32>
    %51 = vector.extract %50[0, 0, 0] : f32 from vector<1x1x1xf32>
    %cst_20 = arith.constant 0.000000e+00 : f32
    %52 = arith.subf %cst_20, %51 : f32
    %cst_21 = arith.constant 3.200000e+01 : f32
    %53 = arith.divf %52, %cst_21 : f32
    %cst_22 = arith.constant 1.000000e+00 : f32
    %54 = vector.broadcast %cst_22 : f32 to vector<32x1xf32>
    %55 = arith.subf %54, %3 : vector<32x1xf32>
    %56 = arith.subf %11, %17 : vector<32x1xf32>
    %cst_23 = arith.constant 0.000000e+00 : f32
    %57 = vector.broadcast %cst_23 : f32 to vector<32x1xf32>
    %58 = arith.minimumf %56, %57 : vector<32x1xf32>
    %59 = math.absf %56 : vector<32x1xf32>
    %cst_24 = arith.constant 0.000000e+00 : f32
    %60 = vector.broadcast %cst_24 : f32 to vector<32x1xf32>
    %61 = arith.subf %60, %59 : vector<32x1xf32>
    %62 = math.exp %61 : vector<32x1xf32>
    %cst_25 = arith.constant 1.000000e+00 : f32
    %63 = vector.broadcast %cst_25 : f32 to vector<32x1xf32>
    %64 = arith.addf %63, %62 : vector<32x1xf32>
    %65 = math.log %64 : vector<32x1xf32>
    %66 = arith.subf %58, %65 : vector<32x1xf32>
    %67 = arith.mulf %55, %66 : vector<32x1xf32>
    %68 = vector.shape_cast %67 : vector<32x1xf32> to vector<1x32x1xf32>
    %cst_26 = arith.constant dense<0.000000e+00> : vector<1xf32>
    %69 = vector.multi_reduction <add>, %68, %cst_26 [1, 2] : vector<1x32x1xf32> to vector<1xf32>
    %70 = vector.shape_cast %69 : vector<1xf32> to vector<1x1x1xf32>
    %71 = vector.extract %70[0, 0, 0] : f32 from vector<1x1x1xf32>
    %cst_27 = arith.constant 3.200000e+01 : f32
    %72 = arith.divf %71, %cst_27 : f32
    %73 = arith.subf %53, %72 : f32
    %74 = arith.addf %8, %11 : vector<32x1xf32>
    %75 = arith.addf %14, %17 : vector<32x1xf32>
    %76 = arith.subf %74, %75 : vector<32x1xf32>
    %cst_28 = arith.constant 0.000000e+00 : f32
    %77 = vector.broadcast %cst_28 : f32 to vector<32x1xf32>
    %78 = arith.minimumf %76, %77 : vector<32x1xf32>
    %79 = math.absf %76 : vector<32x1xf32>
    %cst_29 = arith.constant 0.000000e+00 : f32
    %80 = vector.broadcast %cst_29 : f32 to vector<32x1xf32>
    %81 = arith.subf %80, %79 : vector<32x1xf32>
    %82 = math.exp %81 : vector<32x1xf32>
    %cst_30 = arith.constant 1.000000e+00 : f32
    %83 = vector.broadcast %cst_30 : f32 to vector<32x1xf32>
    %84 = arith.addf %83, %82 : vector<32x1xf32>
    %85 = math.log %84 : vector<32x1xf32>
    %86 = arith.subf %78, %85 : vector<32x1xf32>
    %87 = vector.shape_cast %86 : vector<32x1xf32> to vector<1x32x1xf32>
    %cst_31 = arith.constant dense<0.000000e+00> : vector<1xf32>
    %88 = vector.multi_reduction <add>, %87, %cst_31 [1, 2] : vector<1x32x1xf32> to vector<1xf32>
    %89 = vector.shape_cast %88 : vector<1xf32> to vector<1x1x1xf32>
    %90 = vector.extract %89[0, 0, 0] : f32 from vector<1x1x1xf32>
    %cst_32 = arith.constant 0.000000e+00 : f32
    %91 = arith.subf %cst_32, %90 : f32
    %cst_33 = arith.constant 3.200000e+01 : f32
    %92 = arith.divf %91, %cst_33 : f32
    %c0_34 = arith.constant 0 : index
    %c0_35 = arith.constant 0 : index
    %93 = vector.load %arg4[%c0_34, %c0_35] : memref<128x128xf32, #tpu.memory_space<vmem>>, vector<128x128xf32>
    %94 = vector.extract_strided_slice %93 {offsets = [0, 0], sizes = [128, 64], strides = [1, 1]} : vector<128x128xf32> to vector<128x64xf32>
    %95 = vector.extract_strided_slice %93 {offsets = [0, 64], sizes = [128, 64], strides = [1, 1]} : vector<128x128xf32> to vector<128x64xf32>
    %96 = arith.subf %94, %95 : vector<128x64xf32>
    %97 = arith.mulf %96, %96 : vector<128x64xf32>
    %cst_36 = arith.constant dense<0.000000e+00> : vector<128xf32>
    %98 = vector.multi_reduction <add>, %97, %cst_36 [1] : vector<128x64xf32> to vector<128xf32>
    %99 = vector.shape_cast %98 : vector<128xf32> to vector<128x1xf32>
    %c0_37 = arith.constant 0 : index
    %c0_38 = arith.constant 0 : index
    %100 = vector.load %arg5[%c0_37, %c0_38] : memref<128x1xf32, #tpu.memory_space<vmem>>, vector<128x1xf32>
    %c0_39 = arith.constant 0 : index
    %c0_40 = arith.constant 0 : index
    %101 = vector.load %arg6[%c0_39, %c0_40] : memref<128x1xf32, #tpu.memory_space<vmem>>, vector<128x1xf32>
    %102 = arith.mulf %100, %99 : vector<128x1xf32>
    %103 = vector.shape_cast %102 : vector<128x1xf32> to vector<1x128x1xf32>
    %cst_41 = arith.constant dense<0.000000e+00> : vector<1xf32>
    %104 = vector.multi_reduction <add>, %103, %cst_41 [1, 2] : vector<1x128x1xf32> to vector<1xf32>
    %105 = vector.shape_cast %104 : vector<1xf32> to vector<1x1x1xf32>
    %106 = vector.extract %105[0, 0, 0] : f32 from vector<1x1x1xf32>
    %107 = vector.shape_cast %100 : vector<128x1xf32> to vector<1x128x1xf32>
    %cst_42 = arith.constant dense<0.000000e+00> : vector<1xf32>
    %108 = vector.multi_reduction <add>, %107, %cst_42 [1, 2] : vector<1x128x1xf32> to vector<1xf32>
    %109 = vector.shape_cast %108 : vector<1xf32> to vector<1x1x1xf32>
    %110 = vector.extract %109[0, 0, 0] : f32 from vector<1x1x1xf32>
    %cst_43 = arith.constant 6.400000e+01 : f32
    %111 = arith.mulf %110, %cst_43 : f32
    %112 = arith.divf %106, %111 : f32
    %113 = arith.mulf %101, %99 : vector<128x1xf32>
    %114 = vector.shape_cast %113 : vector<128x1xf32> to vector<1x128x1xf32>
    %cst_44 = arith.constant dense<0.000000e+00> : vector<1xf32>
    %115 = vector.multi_reduction <add>, %114, %cst_44 [1, 2] : vector<1x128x1xf32> to vector<1xf32>
    %116 = vector.shape_cast %115 : vector<1xf32> to vector<1x1x1xf32>
    %117 = vector.extract %116[0, 0, 0] : f32 from vector<1x1x1xf32>
    %118 = vector.shape_cast %101 : vector<128x1xf32> to vector<1x128x1xf32>
    %cst_45 = arith.constant dense<0.000000e+00> : vector<1xf32>
    %119 = vector.multi_reduction <add>, %118, %cst_45 [1, 2] : vector<1x128x1xf32> to vector<1xf32>
    %120 = vector.shape_cast %119 : vector<1xf32> to vector<1x1x1xf32>
    %121 = vector.extract %120[0, 0, 0] : f32 from vector<1x1x1xf32>
    %cst_46 = arith.constant 6.400000e+01 : f32
    %122 = arith.mulf %121, %cst_46 : f32
    %123 = arith.divf %117, %122 : f32
    %c0_47 = arith.constant 0 : index
    %124 = memref.load %arg7[%c0_47] : memref<5xf32, #tpu.memory_space<smem>>
    memref.store %35, %arg7[%c0_47] : memref<5xf32, #tpu.memory_space<smem>>
    %c1 = arith.constant 1 : index
    %125 = memref.load %arg7[%c1] : memref<5xf32, #tpu.memory_space<smem>>
    memref.store %73, %arg7[%c1] : memref<5xf32, #tpu.memory_space<smem>>
    %c2 = arith.constant 2 : index
    %126 = memref.load %arg7[%c2] : memref<5xf32, #tpu.memory_space<smem>>
    memref.store %92, %arg7[%c2] : memref<5xf32, #tpu.memory_space<smem>>
    %c3 = arith.constant 3 : index
    %127 = memref.load %arg7[%c3] : memref<5xf32, #tpu.memory_space<smem>>
    memref.store %112, %arg7[%c3] : memref<5xf32, #tpu.memory_space<smem>>
    %c4 = arith.constant 4 : index
    %128 = memref.load %arg7[%c4] : memref<5xf32, #tpu.memory_space<smem>>
    memref.store %123, %arg7[%c4] : memref<5xf32, #tpu.memory_space<smem>>
    return
  }
}

</mosaic_0001>

<bundles_post_ra>
// kernel: lgndice_forward.3
= control target key start
LH: loop header
LB: loop body
LE: loop exit
PB: predicated region body
PF: predicated region fallthrough
CT: control target
= control target key end

     0   :  { %s551_s1 = inlined_call_operand.vmem [shape: bf16[128,128], index: 1, kind: input, shape index: {}]   ;;  %s552_s0 = inlined_call_operand.vmem [shape: bf16[128,128], index: 0, kind: input, shape index: {}]   ;;  %s553_s2 = inlined_call_operand.vmem [shape: f32[128,128], index: 2, kind: output, shape index: {}]  }
   0x1   :  { %v424_v0 = vld [vmem:[%s551_s1 + $0x38] sm:$0xff]   ;;  %v425_v1 = vld [vmem:[%s551_s1 + $0x30] sm:$0xff]   ;;  %v426_v2 = vld [vmem:[%s551_s1 + $0x28] sm:$0xff]  }
   0x2   :  { %376 = vmatprep.subr.bf16.mxu0 %v424_v0  ;;  %408 = vmatprep.subr.bf16.mxu1 %v424_v0  ;;  %v427_v3 = vld [vmem:[%s551_s1 + $0x20] sm:$0xff]   ;;  %v428_v6 = vld [vmem:[%s551_s1 + $0x18] sm:$0xff]   ;;  %v429_v7 = vld [vmem:[%s551_s1 + $0x10] sm:$0xff]  }
   0x3   :  { %377 = vmatpush3.bf16.msra.mxu0 %v424_v0  ;;  %416 = vmatpush3.bf16.msra.mxu1 %v424_v0  ;;  %v432_v4 = vld [vmem:[%s552_s0] sm:$0xff]   ;;  %v430_v8 = vld [vmem:[%s551_s1 + $0x8] sm:$0xff]   ;;  %v436_v12 = vld [vmem:[%s552_s0 + $0x10] sm:$0xff]  }
   0x4   :  { %378 = vmatprep.subr.bf16.mxu0 %v425_v1  ;;  %409 = vmatprep.subr.bf16.mxu1 %v425_v1  ;;  %v433_v5 = vld [vmem:[%s552_s0 + $0x20] sm:$0xff]   ;;  %v434_v10 = vld [vmem:[%s552_s0 + $0x8] sm:$0xff]   ;;  %v437_v13 = vld [vmem:[%s552_s0 + $0x30] sm:$0xff]  }
   0x5   :  { %392 = vmatprep.mubr.bf16.mxu0 %v432_v4  ;;  %400 = vmatprep.mubr.bf16.mxu1 %v433_v5  ;;  %v431_v9 = vld [vmem:[%s551_s1] sm:$0xff]   ;;  %v435_v11 = vld [vmem:[%s552_s0 + $0x28] sm:$0xff]   ;;  %v438_v14 = vld [vmem:[%s552_s0 + $0x18] sm:$0xff]  }
   0x6   :  { %v439_v15 = vld [vmem:[%s552_s0 + $0x38] sm:$0xff]  }
   0x7   :  { %379 = vmatpush3.bf16.msra.mxu0 %v425_v1  ;;  %417 = vmatpush3.bf16.msra.mxu1 %v425_v1 }
   0x8   :  { %380 = vmatprep.subr.bf16.mxu0 %v426_v2  ;;  %410 = vmatprep.subr.bf16.mxu1 %v426_v2 }
   0xb   :  { %381 = vmatpush3.bf16.msra.mxu0 %v426_v2  ;;  %418 = vmatpush3.bf16.msra.mxu1 %v426_v2 }
   0xc   :  { %382 = vmatprep.subr.bf16.mxu0 %v427_v3  ;;  %411 = vmatprep.subr.bf16.mxu1 %v427_v3 }
   0xf   :  { %383 = vmatpush3.bf16.msra.mxu0 %v427_v3  ;;  %419 = vmatpush3.bf16.msra.mxu1 %v427_v3 }
  0x10   :  { %384 = vmatprep.subr.bf16.mxu0 %v428_v6  ;;  %412 = vmatprep.subr.bf16.mxu1 %v428_v6 }
  0x13   :  { %385 = vmatpush3.bf16.msra.mxu0 %v428_v6  ;;  %420 = vmatpush3.bf16.msra.mxu1 %v428_v6 }
  0x14   :  { %386 = vmatprep.subr.bf16.mxu0 %v429_v7  ;;  %413 = vmatprep.subr.bf16.mxu1 %v429_v7 }
  0x17   :  { %387 = vmatpush3.bf16.msra.mxu0 %v429_v7  ;;  %421 = vmatpush3.bf16.msra.mxu1 %v429_v7 }
  0x18   :  { %388 = vmatprep.subr.bf16.mxu0 %v430_v8  ;;  %414 = vmatprep.subr.bf16.mxu1 %v430_v8 }
  0x1b   :  { %389 = vmatpush3.bf16.msra.mxu0 %v430_v8  ;;  %422 = vmatpush3.bf16.msra.mxu1 %v430_v8 }
  0x1c   :  { %390 = vmatprep.subr.bf16.mxu0 %v431_v9  ;;  %415 = vmatprep.subr.bf16.mxu1 %v431_v9 }
  0x1f   :  { %391 = vmatpush3.bf16.msra.mxu0 %v431_v9  ;;  %423 = vmatpush3.bf16.msra.mxu1 %v431_v9 }
  0x22   :  { %393 = vmatmul.mubr.bf16.vlgmr.msra.gmra.mxu0 %v434_v10  ;;  %401 = vmatmul.mubr.bf16.vlgmr.msra.gmra.mxu1 %v435_v11 }
  0x23   :  { %396 = vmatprep.mubr.bf16.mxu0 %v436_v12  ;;  %404 = vmatprep.mubr.bf16.mxu1 %v437_v13 }
  0x2a   :  { %397 = vmatmul.mubr.bf16.gmra.mxu0 %v438_v14  ;;  %405 = vmatmul.mubr.bf16.gmra.mxu1 %v439_v15 }
  0xe2   :  { %v394_v16 = vpop.f32.mrf.mxu0  ;;  %v402_v17 = vpop.f32.mrf.mxu1 }
  0xe3   :  { %326 = vst [vmem:[%s553_s2 + $0x10] sm:$0xff] %v394_v16  ;;  %334 = vst [vmem:[%s553_s2 + $0x50] sm:$0xff] %v402_v17 }
  0xe4   :  { %v210_v18 = vpop.f32.mrf.mxu0  ;;  %v242_v19 = vpop.f32.mrf.mxu1 }
  0xe5   :  { %324 = vst [vmem:[%s553_s2] sm:$0xff] %v210_v18  ;;  %332 = vst [vmem:[%s553_s2 + $0x40] sm:$0xff] %v242_v19 }
  0xe6   :  { %v395_v20 = vpop.f32.mrf.mxu0  ;;  %v403_v21 = vpop.f32.mrf.mxu1 }
  0xe7   :  { %327 = vst [vmem:[%s553_s2 + $0x18] sm:$0xff] %v395_v20  ;;  %335 = vst [vmem:[%s553_s2 + $0x58] sm:$0xff] %v403_v21 }
  0xe8   :  { %v213_v22 = vpop.f32.mrf.mxu0  ;;  %v245_v23 = vpop.f32.mrf.mxu1 }
  0xe9   :  { %325 = vst [vmem:[%s553_s2 + $0x8] sm:$0xff] %v213_v22  ;;  %333 = vst [vmem:[%s553_s2 + $0x48] sm:$0xff] %v245_v23 }
  0xea   :  { %v398_v24 = vpop.f32.mrf.mxu0  ;;  %v406_v25 = vpop.f32.mrf.mxu1 }
  0xeb   :  { %330 = vst [vmem:[%s553_s2 + $0x30] sm:$0xff] %v398_v24  ;;  %338 = vst [vmem:[%s553_s2 + $0x70] sm:$0xff] %v406_v25 }
  0xec   :  { %v226_v26 = vpop.f32.mrf.mxu0  ;;  %v258_v27 = vpop.f32.mrf.mxu1 }
  0xed   :  { %328 = vst [vmem:[%s553_s2 + $0x20] sm:$0xff] %v226_v26  ;;  %336 = vst [vmem:[%s553_s2 + $0x60] sm:$0xff] %v258_v27 }
  0xee   :  { %v399_v28 = vpop.f32.mrf.mxu0  ;;  %v407_v29 = vpop.f32.mrf.mxu1 }
  0xef   :  { %331 = vst [vmem:[%s553_s2 + $0x38] sm:$0xff] %v399_v28  ;;  %339 = vst [vmem:[%s553_s2 + $0x78] sm:$0xff] %v407_v29 }
  0xf0   :  { %v229_v30 = vpop.f32.mrf.mxu0  ;;  %v261_v31 = vpop.f32.mrf.mxu1 }
  0xf1   :  { %329 = vst [vmem:[%s553_s2 + $0x28] sm:$0xff] %v229_v30  ;;  %337 = vst [vmem:[%s553_s2 + $0x68] sm:$0xff] %v261_v31 }

// kernel: lgndice_forward.5
= control target key start
LH: loop header
LB: loop body
LE: loop exit
PB: predicated region body
PF: predicated region fallthrough
CT: control target
= control target key end

     0   :  { %s920_s13 = smov 64   ;;  %s1651_s0 = inlined_call_operand.vmem [shape: f32[32,128], index: 0, kind: input, shape index: {}]   ;;  %s1652_s1 = inlined_call_operand.vmem [shape: f32[32,128], index: 1, kind: input, shape index: {}]   ;;  %s1653_s2 = inlined_call_operand.vmem [shape: f32[32,128], index: 2, kind: input, shape index: {}]   ;;  %s1654_s3 = inlined_call_operand.vmem [shape: f32[32,1], index: 3, kind: input, shape index: {}]   ;;  %s1655_s4 = inlined_call_operand.vmem [shape: f32[128,128], index: 4, kind: input, shape index: {}]   ;;  %s1656_s5 = inlined_call_operand.vmem [shape: f32[128,1], index: 5, kind: input, shape index: {}]   ;;  %s1657_s6 = inlined_call_operand.vmem [shape: f32[128,1], index: 6, kind: input, shape index: {}]   ;;  %s1658_s7 = inlined_call_operand.vmem [shape: f32[5], index: 7, kind: output, shape index: {}]  }
   0x1   :  { %v27_v0 = vld [vmem:[%s1651_s0] sm:$0xff]  ;;  %v28_v5 = vld [vmem:[%s1651_s0 + $0x8] sm:$0xff]  ;;  %v29_v10 = vld [vmem:[%s1651_s0 + $0x10] sm:$0xff] }
   0x2   :  { %v35_v1 = vld [vmem:[%s1653_s2] sm:$0xff]  ;;  %v36_v6 = vld [vmem:[%s1653_s2 + $0x8] sm:$0xff]  ;;  %v37_v11 = vld [vmem:[%s1653_s2 + $0x10] sm:$0xff] }
   0x3   :  { %v31_v2 = vld [vmem:[%s1652_s1] sm:$0xff]  ;;  %v971_v3 = vmul.f32 %v35_v1, %v27_v0  ;;  %v32_v7 = vld [vmem:[%s1652_s1 + $0x8] sm:$0xff]  ;;  %v48_v8 = vmul.f32 %v36_v6, %v28_v5  ;;  %v33_v12 = vld [vmem:[%s1652_s1 + $0x10] sm:$0xff]  ;;  %v49_v13 = vmul.f32 %v37_v11, %v29_v10 }
   0x4   :  { %v43_v4 = vmul.f32 %v31_v2, %v27_v0  ;;  %v44_v9 = vmul.f32 %v32_v7, %v28_v5  ;;  %v45_v14 = vmul.f32 %v33_v12, %v29_v10  ;;  %v30_v15 = vld [vmem:[%s1651_s0 + $0x18] sm:$0xff] }
   0x5   :  { %108 = vrot.lane.b32.xlu1 %v971_v3, %s920_s13  ;;  %v38_v16 = vld [vmem:[%s1653_s2 + $0x18] sm:$0xff] }
   0x6   :  { %68 = vrot.lane.b32.xlu0 %v43_v4, %s920_s13  ;;  %v34_v17 = vld [vmem:[%s1652_s1 + $0x18] sm:$0xff] }
   0x9   :  { %110 = vrot.lane.b32.xlu1 %v48_v8, %s920_s13 }
   0xa   :  { %70 = vrot.lane.b32.xlu0 %v44_v9, %s920_s13 }
   0xb   :  { %12 = vsyncpa [#allocation3], 0  ;;  %v50_v18 = vmul.f32 %v38_v16, %v30_v15  ;;  %v46_v19 = vmul.f32 %v34_v17, %v30_v15  ;;  %v1012_v20 = vld [vmem:[%s1655_s4 + $0x8] sm:$0xff]  ;;  %v1017_v21 = vld [vmem:[%s1655_s4] sm:$0xff]  ;;  %vm51_vm0 = vcmask 523264   ;;  %vm176_vm1 = vcmask 7168  }
   0xc   :  { %v1026_v22 = vld [vmem:[%s1655_s4 + $0x18] sm:$0xff]  ;;  %v1031_v23 = vld [vmem:[%s1655_s4 + $0x10] sm:$0xff]  ;;  %v1040_v24 = vld [vmem:[%s1655_s4 + $0x28] sm:$0xff]  ;;  %v52_v36 = vsel %vm51_vm0, %v43_v4, 0.0  ;;  %v95_v37 = vsel %vm51_vm0, %v48_v8, 0.0  ;;  %v55_v38 = vsel %vm51_vm0, %v44_v9, 0.0 }
   0xd   :  { %112 = vrot.lane.b32.xlu1 %v49_v13, %s920_s13  ;;  %v1045_v25 = vld [vmem:[%s1655_s4 + $0x20] sm:$0xff]  ;;  %v1054_v26 = vld [vmem:[%s1655_s4 + $0x38] sm:$0xff]  ;;  %v1059_v27 = vld [vmem:[%s1655_s4 + $0x30] sm:$0xff]  ;;  %v92_v39 = vsel %vm51_vm0, %v971_v3, 0.0  ;;  %v58_v40 = vsel %vm51_vm0, %v45_v14, 0.0  ;;  %v98_v41 = vsel %vm51_vm0, %v49_v13, 0.0 }
   0xe   :  { %72 = vrot.lane.b32.xlu0 %v45_v14, %s920_s13  ;;  %v1068_v28 = vld [vmem:[%s1655_s4 + $0x48] sm:$0xff]  ;;  %v1073_v29 = vld [vmem:[%s1655_s4 + $0x40] sm:$0xff]  ;;  %v1082_v30 = vld [vmem:[%s1655_s4 + $0x58] sm:$0xff]  ;;  %v61_v42 = vsel %vm51_vm0, %v46_v19, 0.0  ;;  %v101_v47 = vsel %vm51_vm0, %v50_v18, 0.0  ;;  %s807_s15 = sshll.u32 %s1658_s7, 4  ;;  %s808_s15 = int_to_ptr.vmem [resolvable:$true] %s807_s15 }
   0xf   :  { %v1087_v31 = vld [vmem:[%s1655_s4 + $0x50] sm:$0xff]  ;;  %v1096_v32 = vld [vmem:[%s1655_s4 + $0x68] sm:$0xff]  ;;  %v1101_v33 = vld [vmem:[%s1655_s4 + $0x60] sm:$0xff]  ;;  %s906_s18 = scalar_lea.vmem %s808_s15, 16  ;;  %p911_p1 = scmp.lt.s32.totalorder %s808_s15, %s808_s15 }
  0x10   :  { %v1110_v34 = vld [vmem:[%s1655_s4 + $0x78] sm:$0xff]  ;;  %v1115_v35 = vld [vmem:[%s1655_s4 + $0x70] sm:$0xff]  ;;  %p907_p0 = scmp.ne.s32.totalorder %s808_s15, %s906_s18  ;;  %p912_p2 = scmp.lt.s32.totalorder %s906_s18, %s906_s18 }
  0x11   :  { %114 = vrot.lane.b32.xlu1 %v50_v18, %s920_s13 }
  0x12   :  { %74 = vrot.lane.b32.xlu0 %v46_v19, %s920_s13  ;;  %p913_p3 = por %p912_p2, %p911_p1 }
  0x14   :  { %p914_p4 = pnand %p913_p3, %p907_p0 }
  0x15   :  { %431 = vrot.lane.b32.xlu1 %v1012_v20, %s920_s13 }
  0x16   :  { %429 = vrot.lane.b32.xlu0 %v1017_v21, %s920_s13 }
  0x19   :  { %435 = vrot.lane.b32.xlu1 %v1026_v22, %s920_s13 }
  0x1a   :  { %433 = vrot.lane.b32.xlu0 %v1031_v23, %s920_s13 }
  0x1d   :  { %439 = vrot.lane.b32.xlu1 %v1040_v24, %s920_s13 }
  0x1e   :  { %437 = vrot.lane.b32.xlu0 %v1045_v25, %s920_s13 }
  0x21   :  { %443 = vrot.lane.b32.xlu1 %v1054_v26, %s920_s13 }
  0x22   :  { %441 = vrot.lane.b32.xlu0 %v1059_v27, %s920_s13 }
  0x25   :  { %447 = vrot.lane.b32.xlu1 %v1068_v28, %s920_s13 }
  0x26   :  { %445 = vrot.lane.b32.xlu0 %v1073_v29, %s920_s13 }
  0x29   :  { %451 = vrot.lane.b32.xlu1 %v1082_v30, %s920_s13 }
  0x2a   :  { %449 = vrot.lane.b32.xlu0 %v1087_v31, %s920_s13 }
  0x2d   :  { %455 = vrot.lane.b32.xlu1 %v1096_v32, %s920_s13 }
  0x2e   :  { %453 = vrot.lane.b32.xlu0 %v1101_v33, %s920_s13 }
  0x31   :  { %459 = vrot.lane.b32.xlu1 %v1110_v34, %s920_s13 }
  0x32   :  { %457 = vrot.lane.b32.xlu0 %v1115_v35, %s920_s13 }
  0x51   :  { %53 = vadd.xlane.f32.xlu0 %v52_v36 }
  0x55   :  { %96 = vadd.xlane.f32.xlu0 %v95_v37  ;;  %56 = vadd.xlane.f32.xlu1 %v55_v38 }
  0x59   :  { %93 = vadd.xlane.f32.xlu1 %v92_v39 }
  0x5d   :  { %59 = vadd.xlane.f32.xlu1 %v58_v40 }
  0x61   :  { %99 = vadd.xlane.f32.xlu1 %v98_v41 }
  0x65   :  { %62 = vadd.xlane.f32.xlu1 %v61_v42 }
  0x77   :  { %v109_v43 = vpop.permute.xlu1 %108 }
  0x78   :  { %v69_v44 = vpop.permute.xlu0 %68  ;;  %v120_v45 = vsel %vm51_vm0, %v109_v43, 0.0 }
  0x79   :  { %v80_v46 = vsel %vm51_vm0, %v69_v44, 0.0  ;;  %121 = vadd.xlane.f32.xlu1 %v120_v45 }
  0x7a   :  { %81 = vadd.xlane.f32.xlu0 %v80_v46 }
  0x7b   :  { %v111_v49 = vpop.permute.xlu1 %110 }
  0x7c   :  { %v71_v48 = vpop.permute.xlu0 %70  ;;  %v123_v51 = vsel %vm51_vm0, %v111_v49, 0.0 }
  0x7d   :  { %v83_v50 = vsel %vm51_vm0, %v71_v48, 0.0  ;;  %102 = vadd.xlane.f32.xlu1 %v101_v47 }
  0x7e   :  { %84 = vadd.xlane.f32.xlu0 %v83_v50 }
  0x7f   :  { %v113_v53 = vpop.permute.xlu1 %112 }
  0x80   :  { %v73_v52 = vpop.permute.xlu0 %72  ;;  %v126_v57 = vsel %vm51_vm0, %v113_v53, 0.0 }
  0x81   :  { %v86_v54 = vsel %vm51_vm0, %v73_v52, 0.0 }
  0x82   :  { %124 = vadd.xlane.f32.xlu0 %v123_v51 }
  0x83   :  { %v115_v56 = vpop.permute.xlu1 %114 }
  0x84   :  { %v75_v55 = vpop.permute.xlu0 %74  ;;  %v129_v4 = vsel %vm51_vm0, %v115_v56, 0.0 }
  0x85   :  { %v89_v61 = vsel %vm51_vm0, %v75_v55, 0.0 }
  0x86   :  { %87 = vadd.xlane.f32.xlu0 %v86_v54 }
  0x87   :  { %v432_v59 = vpop.permute.xlu1 %431 }
  0x88   :  { %v430_v58 = vpop.permute.xlu0 %429  ;;  %v478_v63 = vsub.f32 %v1012_v20, %v432_v59 }
  0x89   :  { %v477_v60 = vsub.f32 %v1017_v21, %v430_v58 }
  0x8a   :  { %127 = vadd.xlane.f32.xlu0 %v126_v57  ;;  %v494_v5 = vmul.f32 %v478_v63, %v478_v63 }
  0x8b   :  { %v493_v62 = vmul.f32 %v477_v60, %v477_v60  ;;  %v436_v1 = vpop.permute.xlu1 %435 }
  0x8c   :  { %v434_v0 = vpop.permute.xlu0 %433  ;;  %v480_v7 = vsub.f32 %v1026_v22, %v436_v1  ;;  %v512_v14 = vsel %vm51_vm0, %v494_v5, 0.0 }
  0x8d   :  { %v479_v2 = vsub.f32 %v1031_v23, %v434_v0  ;;  %v509_v3 = vsel %vm51_vm0, %v493_v62, 0.0 }
  0x8e   :  { %90 = vadd.xlane.f32.xlu0 %v89_v61  ;;  %510 = vadd.xlane.f32.xlu1 %v509_v3  ;;  %v496_v12 = vmul.f32 %v480_v7, %v480_v7 }
  0x8f   :  { %v495_v6 = vmul.f32 %v479_v2, %v479_v2  ;;  %v440_v9 = vpop.permute.xlu1 %439 }
  0x90   :  { %v438_v8 = vpop.permute.xlu0 %437  ;;  %v482_v15 = vsub.f32 %v1040_v24, %v440_v9  ;;  %v518_v22 = vsel %vm51_vm0, %v496_v12, 0.0  ;;  %v1200_v12 = vld [vmem:[%s1656_s5] sm:$0xff] }
  0x91   :  { %v481_v10 = vsub.f32 %v1045_v25, %v438_v8  ;;  %v515_v11 = vsel %vm51_vm0, %v495_v6, 0.0 }
  0x92   :  { %130 = vadd.xlane.f32.xlu0 %v129_v4  ;;  %516 = vadd.xlane.f32.xlu1 %v515_v11  ;;  %v498_v20 = vmul.f32 %v482_v15, %v482_v15 }
  0x93   :  { %v497_v13 = vmul.f32 %v481_v10, %v481_v10  ;;  %v444_v17 = vpop.permute.xlu1 %443 }
  0x94   :  { %v442_v16 = vpop.permute.xlu0 %441  ;;  %v484_v23 = vsub.f32 %v1054_v26, %v444_v17  ;;  %v524_v39 = vsel %vm51_vm0, %v498_v20, 0.0 }
  0x95   :  { %v483_v18 = vsub.f32 %v1059_v27, %v442_v16  ;;  %v521_v19 = vsel %vm51_vm0, %v497_v13, 0.0  ;;  %v1205_v13 = vld [vmem:[%s1656_s5 + $0x8] sm:$0xff] }
  0x96   :  { %513 = vadd.xlane.f32.xlu0 %v512_v14  ;;  %522 = vadd.xlane.f32.xlu1 %v521_v19  ;;  %v500_v38 = vmul.f32 %v484_v23, %v484_v23  ;;  %v645_v14 = vsel %vm176_vm1, %v1200_v12, 0.0  ;;  %v646_v15 = vsel %vm176_vm1, %v1205_v13, 0.0  ;;  %v1214_v19 = vld [vmem:[%s1656_s5 + $0x10] sm:$0xff]  ;;  %v1221_v23 = vld [vmem:[%s1656_s5 + $0x18] sm:$0xff] }
  0x97   :  { %v499_v21 = vmul.f32 %v483_v18, %v483_v18  ;;  %v448_v36 = vpop.permute.xlu1 %447  ;;  %v647_v18 = vadd.f32 %v646_v15, %v645_v14  ;;  %v648_v20 = vsel %vm176_vm1, %v1214_v19, 0.0  ;;  %v1311_v14 = vld [vmem:[%s1657_s6 + $0x28] sm:$0xff] }
  0x98   :  { %v446_v25 = vpop.permute.xlu0 %445  ;;  %v486_v40 = vsub.f32 %v1068_v28, %v448_v36  ;;  %v530_v45 = vsel %vm51_vm0, %v500_v38, 0.0  ;;  %v1228_v36 = vld [vmem:[%s1657_s6] sm:$0xff] }
  0x99   :  { %v485_v37 = vsub.f32 %v1073_v29, %v446_v25  ;;  %v527_v24 = vsel %vm51_vm0, %v499_v21, 0.0  ;;  %v650_v25 = vsel %vm176_vm1, %v1221_v23, 0.0 }
  0x9a   :  { %519 = vadd.xlane.f32.xlu0 %v518_v22  ;;  %528 = vadd.xlane.f32.xlu1 %v527_v24  ;;  %v502_v44 = vmul.f32 %v486_v40, %v486_v40  ;;  %v649_v22 = vadd.f32 %v648_v20, %v647_v18  ;;  %v755_v20 = vsel %vm176_vm1, %v1311_v14, 0.0 }
  0x9b   :  { %v501_v27 = vmul.f32 %v485_v37, %v485_v37  ;;  %v452_v42 = vpop.permute.xlu1 %451  ;;  %v1233_v37 = vld [vmem:[%s1657_s6 + $0x8] sm:$0xff] }
  0x9c   :  { %v450_v41 = vpop.permute.xlu0 %449  ;;  %v488_v46 = vsub.f32 %v1082_v30, %v452_v42  ;;  %v536_v51 = vsel %vm51_vm0, %v502_v44, 0.0  ;;  %v651_v40 = vadd.f32 %v650_v25, %v649_v22  ;;  %v1249_v44 = vld [vmem:[%s1657_s6 + $0x10] sm:$0xff]  ;;  %v1331_v22 = vld [vmem:[%s1657_s6 + $0x38] sm:$0xff]  ;;  %v1336_v25 = vld [vmem:[%s1656_s5 + $0x40] sm:$0xff] }
  0x9d   :  { %v487_v43 = vsub.f32 %v1087_v31, %v450_v41  ;;  %v533_v26 = vsel %vm51_vm0, %v501_v27, 0.0  ;;  %v746_v27 = vsel %vm176_vm1, %v1228_v36, 0.0  ;;  %v1242_v41 = vld [vmem:[%s1656_s5 + $0x20] sm:$0xff] }
  0x9e   :  { %525 = vadd.xlane.f32.xlu0 %v524_v39  ;;  %534 = vadd.xlane.f32.xlu1 %v533_v26  ;;  %v504_v50 = vmul.f32 %v488_v46, %v488_v46  ;;  %v747_v39 = vsel %vm176_vm1, %v1233_v37, 0.0 }
  0x9f   :  { %v503_v29 = vmul.f32 %v487_v43, %v487_v43  ;;  %v456_v48 = vpop.permute.xlu1 %455  ;;  %v652_v43 = vsel %vm176_vm1, %v1242_v41, 0.0  ;;  %v748_v26 = vadd.f32 %v747_v39, %v746_v27  ;;  %v1345_v27 = vld [vmem:[%s1657_s6 + $0x40] sm:$0xff]  ;;  %v660_v39 = vsel %vm176_vm1, %v1336_v25, 0.0 }
  0xa0   :  { %v454_v47 = vpop.permute.xlu0 %453  ;;  %v490_v52 = vsub.f32 %v1096_v32, %v456_v48  ;;  %v542_v57 = vsel %vm51_vm0, %v504_v50, 0.0  ;;  %v653_v46 = vadd.f32 %v652_v43, %v651_v40  ;;  %1669 = vst [vmem:[#allocation6_spill] sm:$0xff] %v1345_v27 }
  0xa1   :  { %v489_v49 = vsub.f32 %v1101_v33, %v454_v47  ;;  %v539_v28 = vsel %vm51_vm0, %v503_v29, 0.0  ;;  %v1258_v47 = vld [vmem:[%s1656_s5 + $0x28] sm:$0xff] }
  0xa2   :  { %531 = vadd.xlane.f32.xlu0 %v530_v45  ;;  %540 = vadd.xlane.f32.xlu1 %v539_v28  ;;  %v506_v56 = vmul.f32 %v490_v52, %v490_v52  ;;  %v749_v45 = vsel %vm176_vm1, %v1249_v44, 0.0  ;;  %v654_v48 = vsel %vm176_vm1, %v1258_v47, 0.0  ;;  %v1265_v28 = vld [vmem:[%s1657_s6 + $0x18] sm:$0xff]  ;;  %v1272_v52 = vld [vmem:[%s1656_s5 + $0x30] sm:$0xff] }
  0xa3   :  { %v505_v31 = vmul.f32 %v489_v49, %v489_v49  ;;  %v460_v54 = vpop.permute.xlu1 %459  ;;  %v750_v49 = vadd.f32 %v749_v45, %v748_v26  ;;  %v751_v50 = vsel %vm176_vm1, %v1265_v28, 0.0  ;;  %v1353_v45 = vsel %vm176_vm1, %v1345_v27, 0.0 }
  0xa4   :  { %v458_v53 = vpop.permute.xlu0 %457  ;;  %v492_v58 = vsub.f32 %v1110_v34, %v460_v54  ;;  %v548_v32 = vsel %vm51_vm0, %v506_v56, 0.0 }
  0xa5   :  { %v491_v55 = vsub.f32 %v1115_v35, %v458_v53  ;;  %v545_v30 = vsel %vm51_vm0, %v505_v31, 0.0 }
  0xa6   :  { %537 = vadd.xlane.f32.xlu0 %v536_v51  ;;  %546 = vadd.xlane.f32.xlu1 %v545_v30  ;;  %v508_v60 = vmul.f32 %v492_v58, %v492_v58  ;;  %v655_v51 = vadd.f32 %v654_v48, %v653_v46  ;;  %v1358_v46 = vld [vmem:[%s1656_s5 + $0x48] sm:$0xff] }
  0xa7   :  { %v507_v33 = vmul.f32 %v491_v55, %v491_v55  ;;  %v656_v55 = vsel %vm176_vm1, %v1272_v52, 0.0  ;;  %v1363_v48 = vld [vmem:[%s1657_s6 + $0x48] sm:$0xff] }
  0xa8   :  { %v554_v35 = vsel %vm51_vm0, %v508_v60, 0.0  ;;  %v1290_v60 = vld [vmem:[%s1654_s3 + $0x8] sm:$0xff]  ;;  %1671 = vst [vmem:[#allocation8_spill] sm:$0xff] %v1363_v48 }
  0xa9   :  { %v551_v59 = vsel %vm51_vm0, %v507_v33, 0.0  ;;  %v752_v33 = vadd.f32 %v751_v50, %v750_v49  ;;  %v1368_v49 = vld [vmem:[%s1656_s5 + $0x50] sm:$0xff] }
  0xaa   :  { %543 = vadd.xlane.f32.xlu0 %v542_v57  ;;  %552 = vadd.xlane.f32.xlu1 %v551_v59  ;;  %v1283_v57 = vld [vmem:[%s1657_s6 + $0x20] sm:$0xff]  ;;  %1672 = vst [vmem:[#allocation9_spill] sm:$0xff] %v1368_v49 }
  0xab   :  { %v753_v59 = vsel %vm176_vm1, %v1283_v57, 0.0 }
  0xac   :  { %v754_v18 = vadd.f32 %v753_v59, %v752_v33 }
  0xae   :  { %549 = vadd.xlane.f32.xlu0 %v548_v32  ;;  %v1295_v32 = vld [vmem:[%s1654_s3] sm:$0xff] }
  0xb2   :  { %555 = vadd.xlane.f32.xlu0 %v554_v35 }
  0xda   :  { %v1170_v61 = vpop.xlane.xlu0 %53 }
  0xde   :  { %v1172_v62 = vpop.xlane.xlu0 %96  ;;  %v1174_v63 = vpop.xlane.xlu1 %56 }
  0xdf   :  { %v1178_v34 = vsub.f32 %v1174_v63, %v1172_v62 }
  0xe1   :  { %v141_v0 = vand.u32 2147483647, %v1178_v34 }
  0xe2   :  { %v1181_v1 = vpop.xlane.xlu1 %93 }
  0xe3   :  { %v145_v2 = vsub.f32 0.0, %v141_v0  ;;  %v1185_v3 = vsub.f32 %v1170_v61, %v1181_v1 }
  0xe5   :  { %v150_v4 = vmul.f32 1.442695, %v145_v2  ;;  %v140_v5 = vand.u32 2147483647, %v1185_v3 }
  0xe6   :  { %v1188_v6 = vpop.xlane.xlu1 %59 }
  0xe7   :  { %v144_v7 = vsub.f32 0.0, %v140_v5  ;;  %838 = vpow2.f32 %v150_v4  ;;  %v657_v4 = vadd.f32 %v656_v55, %v655_v51  ;;  %v1303_v5 = vld [vmem:[%s1656_s5 + $0x38] sm:$0xff]  ;;  %v662_v51 = vsel %vm176_vm1, %v1358_v46, 0.0 }
  0xe9   :  { %v148_v8 = vmul.f32 1.442695, %v144_v7 }
  0xea   :  { %v1190_v9 = vpop.xlane.xlu1 %99 }
  0xeb   :  { %840 = vpow2.f32 %v148_v8  ;;  %v1194_v10 = vsub.f32 %v1188_v6, %v1190_v9 }
  0xed   :  { %v142_v11 = vand.u32 2147483647, %v1194_v10 }
  0xee   :  { %v1251_v29 = vpop.xlane.xlu1 %62 }
  0xef   :  { %v146_v16 = vsub.f32 0.0, %v142_v11 }
  0xf1   :  { %v152_v17 = vmul.f32 1.442695, %v146_v16 }
  0xf3   :  { %842 = vpow2.f32 %v152_v17 }
  0xf4   :  { %v839_v21 = vpop.eup %838 }
  0xf5   :  { %v157_v38 = vadd.f32 1.0, %v839_v21  ;;  %v1326_v21 = vld [vmem:[%s1657_s6 + $0x30] sm:$0xff] }
  0xf7   :  { %844 = vlog2.f32 %v157_v38  ;;  %v759_v38 = vsel %vm176_vm1, %v1331_v22, 0.0 }
  0xf8   :  { %v841_v24 = vpop.eup %840 }
  0xf9   :  { %v156_v42 = vadd.f32 1.0, %v841_v24  ;;  %v757_v24 = vsel %vm176_vm1, %v1326_v21, 0.0 }
  0xfb   :  { %846 = vlog2.f32 %v156_v42 }
 0x100   :  { %v843_v31 = vpop.eup %842 }
 0x101   :  { %v158_v58 = vadd.f32 1.0, %v843_v31 }
 0x102   :  { %v122_v53 = vpop.xlane.xlu1 %121 }
 0x103   :  { %v82_v54 = vpop.xlane.xlu0 %81  ;;  %v333_v35 = vadd.f32 %v122_v53, %v1181_v1  ;;  %v658_v1 = vsel %vm176_vm1, %v1303_v5, 0.0  ;;  %848 = vlog2.f32 %v158_v58 }
 0x104   :  { %v1276_v30 = vsub.f32 %v122_v53, %v82_v54  ;;  %v1278_v56 = vsub.f32 %v82_v54, %v122_v53  ;;  %v329_v2 = vadd.f32 %v82_v54, %v1170_v61  ;;  %v845_v40 = vpop.eup %844  ;;  %v659_v26 = vadd.f32 %v658_v1, %v657_v4 }
 0x105   :  { %v1375_v53 = vsel %vm176_vm1, %v1363_v48, 0.0  ;;  %v664_v54 = vsel %vm176_vm1, %v1368_v49, 0.0 }
 0x106   :  { %1668 = vst [vmem:[#allocation5_spill] sm:$0xff] %v1278_v56  ;;  %v205_v0 = vand.u32 2147483647, %v1276_v30  ;;  %v273_v7 = vand.u32 2147483647, %v1278_v56  ;;  %v1306_v8 = vpop.xlane.xlu1 %102  ;;  %v1349_v43 = vsub.f32 %v329_v2, %v333_v35  ;;  %1673 = vst [vmem:[#allocation10_spill] sm:$0xff] %v1375_v53  ;;  %v756_v35 = vadd.f32 %v755_v20, %v754_v18 }
 0x107   :  { %v85_v11 = vpop.xlane.xlu0 %84  ;;  %v1319_v17 = vsub.f32 %v1251_v29, %v1306_v8  ;;  %v661_v53 = vadd.f32 %v660_v39, %v659_v26  ;;  %v137_v18 = vmin.f32 %v1178_v34, 0.0  ;;  %v1396_v39 = vld [vmem:[%s1657_s6 + $0x50] sm:$0xff] }
 0x108   :  { %v209_v16 = vsub.f32 0.0, %v205_v0  ;;  %v277_v42 = vsub.f32 0.0, %v273_v7  ;;  %1670 = vst [vmem:[#allocation7_spill] sm:$0xff] %v1349_v43  ;;  %v847_v55 = vpop.eup %846  ;;  %v163_v0 = vmul.f32 0.6931472, %v845_v40  ;;  %v330_v4 = vadd.f32 %v85_v11, %v1174_v63 }
 0x109   :  { %v143_v50 = vand.u32 2147483647, %v1319_v17  ;;  %v345_v61 = vand.u32 2147483647, %v1349_v43  ;;  %v161_v49 = vmul.f32 0.6931472, %v847_v55  ;;  %v758_v63 = vadd.f32 %v757_v24, %v756_v35 }
 0x10a   :  { %v213_v33 = vmul.f32 1.442695, %v209_v16  ;;  %v281_v1 = vmul.f32 1.442695, %v277_v42  ;;  %v1401_v42 = vld [vmem:[%s1656_s5 + $0x58] sm:$0xff]  ;;  %v169_v24 = vsub.f32 %v137_v18, %v163_v0  ;;  %v663_v35 = vadd.f32 %v662_v51, %v661_v53 }
 0x10b   :  { %v125_v31 = vpop.xlane.xlu0 %124  ;;  %v147_v2 = vsub.f32 0.0, %v143_v50  ;;  %v760_v0 = vadd.f32 %v759_v38, %v758_v63 }
 0x10c   :  { %v1379_v58 = vsub.f32 %v125_v31, %v85_v11  ;;  %v1381_v59 = vsub.f32 %v85_v11, %v125_v31  ;;  %v334_v7 = vadd.f32 %v125_v31, %v1172_v62  ;;  %850 = vpow2.f32 %v213_v33 }
 0x10d   :  { %v154_v48 = vmul.f32 1.442695, %v147_v2  ;;  %v136_v62 = vmin.f32 %v1185_v3, 0.0  ;;  %v1409_v3 = vsel %vm176_vm1, %v1401_v42, 0.0 }
 0x10e   :  { %v206_v15 = vand.u32 2147483647, %v1379_v58  ;;  %v274_v16 = vand.u32 2147483647, %v1381_v59  ;;  %v1388_v56 = vsub.f32 %v330_v4, %v334_v7  ;;  %v1419_v7 = vld [vmem:[%s1654_s3 + $0x10] sm:$0xff] }
 0x10f   :  { %v88_v27 = vpop.xlane.xlu0 %87  ;;  %852 = vpow2.f32 %v154_v48  ;;  %v168_v26 = vsub.f32 %v136_v62, %v161_v49  ;;  %v349_v48 = vsub.f32 0.0, %v345_v61  ;;  %v1424_v61 = vld [vmem:[%s1657_s6 + $0x58] sm:$0xff] }
 0x110   :  { %1674 = vst [vmem:[#allocation11_spill] sm:$0xff] %v1388_v56  ;;  %v210_v20 = vsub.f32 0.0, %v206_v15  ;;  %v278_v11 = vsub.f32 0.0, %v274_v16  ;;  %v346_v40 = vand.u32 2147483647, %v1388_v56  ;;  %854 = vpow2.f32 %v281_v1  ;;  %v849_v49 = vpop.eup %848 }
 0x111   :  { %v1405_v15 = vsel %vm176_vm1, %v1396_v39, 0.0  ;;  %v1430_v53 = vsel %vm176_vm1, %v1424_v61, 0.0  ;;  %v173_v16 = vmul.f32 %v169_v24, %v1290_v60  ;;  %v172_v38 = vmul.f32 %v168_v26, %v1295_v32 }
 0x112   :  { %v215_v34 = vmul.f32 1.442695, %v210_v20  ;;  %v283_v50 = vmul.f32 1.442695, %v278_v11  ;;  %v350_v2 = vsub.f32 0.0, %v346_v40  ;;  %1675 = vst [vmem:[#allocation12_spill] sm:$0xff] %v1430_v53  ;;  %v331_v20 = vadd.f32 %v88_v27, %v1188_v6 }
 0x113   :  { %v128_v31 = vpop.xlane.xlu0 %127  ;;  %v353_v18 = vmul.f32 1.442695, %v349_v48  ;;  %v1439_v11 = vld [vmem:[%s1654_s3 + $0x18] sm:$0xff]  ;;  %v1447_v26 = vadd.f32 %v1353_v45, %v760_v0  ;;  %v138_v6 = vmin.f32 %v1194_v10, 0.0 }
 0x114   :  { %856 = vpow2.f32 %v215_v34  ;;  %v1411_v55 = vsub.f32 %v128_v31, %v88_v27  ;;  %v1413_v33 = vsub.f32 %v88_v27, %v128_v31  ;;  %v335_v4 = vadd.f32 %v128_v31, %v1190_v9 }
 0x115   :  { %858 = vpow2.f32 %v283_v50  ;;  %v1441_v50 = vadd.f32 %v664_v54, %v663_v35  ;;  %v165_v9 = vmul.f32 0.6931472, %v849_v49  ;;  %v355_v24 = vmul.f32 1.442695, %v350_v2 }
 0x116   :  { %v207_v1 = vand.u32 2147483647, %v1411_v55  ;;  %v275_v51 = vand.u32 2147483647, %v1413_v33  ;;  %v1444_v53 = vsub.f32 %v331_v20, %v335_v4  ;;  %860 = vpow2.f32 %v353_v18 }
 0x117   :  { %v91_v63 = vpop.xlane.xlu0 %90  ;;  %v511_v62 = vpop.xlane.xlu1 %510  ;;  %v1454_v49 = vsel %vm176_vm1, %v172_v38, 0.0  ;;  %v1457_v2 = vsel %vm176_vm1, %v173_v16, 0.0  ;;  %862 = vpow2.f32 %v355_v24 }
 0x118   :  { %v211_v40 = vsub.f32 0.0, %v207_v1  ;;  %v279_v34 = vsub.f32 0.0, %v275_v51  ;;  %1676 = vst [vmem:[#allocation13_spill] sm:$0xff] %v1444_v53  ;;  %v589_v43 = vmul.f32 %v1200_v12, %v511_v62  ;;  %v1464_v12 = vsub.f32 %v138_v6, %v165_v9 }
 0x119   :  { %v851_v51 = vpop.eup %850  ;;  %v347_v18 = vand.u32 2147483647, %v1444_v53  ;;  %v332_v20 = vadd.f32 %v91_v63, %v1251_v29 }
 0x11a   :  { %v217_v48 = vmul.f32 1.442695, %v211_v40  ;;  %v285_v45 = vmul.f32 1.442695, %v279_v34  ;;  %v605_v40 = vsel %vm176_vm1, %v589_v43, 0.0  ;;  %v690_v34 = vmul.f32 %v1228_v36, %v511_v62 }
 0x11b   :  { %v131_v35 = vpop.xlane.xlu0 %130  ;;  %v517_v1 = vpop.xlane.xlu1 %516  ;;  %v221_v54 = vadd.f32 1.0, %v851_v51 }
 0x11c   :  { %v1459_v4 = vsub.f32 %v131_v35, %v91_v63  ;;  %v1461_v10 = vsub.f32 %v91_v63, %v131_v35  ;;  %v336_v0 = vadd.f32 %v131_v35, %v1306_v8  ;;  %v853_v38 = vpop.eup %852  ;;  %864 = vpow2.f32 %v217_v48 }
 0x11d   :  { %v855_v31 = vpop.eup %854  ;;  %v159_v27 = vadd.f32 1.0, %v853_v38  ;;  %v591_v24 = vmul.f32 %v1214_v19, %v517_v1  ;;  %866 = vpow2.f32 %v285_v45  ;;  %v692_v51 = vmul.f32 %v1249_v44, %v517_v1 }
 0x11e   :  { %v208_v16 = vand.u32 2147483647, %v1459_v4  ;;  %v276_v8 = vand.u32 2147483647, %v1461_v10  ;;  %v1472_v35 = vsub.f32 %v332_v20, %v336_v0  ;;  %v289_v53 = vadd.f32 1.0, %v855_v31 }
 0x11f   :  { %v514_v9 = vpop.xlane.xlu0 %513  ;;  %868 = vlog2.f32 %v159_v27  ;;  %v523_v62 = vpop.xlane.xlu1 %522  ;;  %v706_v20 = vsel %vm176_vm1, %v690_v34, 0.0 }
 0x120   :  { %1677 = vst [vmem:[#allocation14_spill] sm:$0xff] %v1472_v35  ;;  %v212_v6 = vsub.f32 0.0, %v208_v16  ;;  %v590_v29 = vmul.f32 %v1205_v13, %v514_v9  ;;  %v691_v63 = vmul.f32 %v1233_v37, %v514_v9  ;;  %v280_v43 = vsub.f32 0.0, %v276_v8 }
 0x121   :  { %v857_v48 = vpop.eup %856  ;;  %v348_v36 = vand.u32 2147483647, %v1472_v35  ;;  %v351_v16 = vsub.f32 0.0, %v347_v18  ;;  %v608_v13 = vsel %vm176_vm1, %v591_v24, 0.0  ;;  %870 = vlog2.f32 %v221_v54 }
 0x122   :  { %v859_v38 = vpop.eup %858  ;;  %v219_v0 = vmul.f32 1.442695, %v212_v6  ;;  %v606_v19 = vsel %vm176_vm1, %v590_v29, 0.0  ;;  %v222_v45 = vadd.f32 1.0, %v857_v48  ;;  %v287_v9 = vmul.f32 1.442695, %v280_v43 }
 0x123   :  { %v607_v56 = vadd.f32 %v606_v19, %v605_v40  ;;  %v520_v37 = vpop.xlane.xlu0 %519  ;;  %v707_v27 = vsel %vm176_vm1, %v691_v63, 0.0  ;;  %v290_v31 = vadd.f32 1.0, %v859_v38  ;;  %v352_v6 = vsub.f32 0.0, %v348_v36  ;;  %v529_v44 = vpop.xlane.xlu1 %528 }
 0x124   :  { %v592_v8 = vmul.f32 %v1221_v23, %v520_v37  ;;  %v708_v35 = vadd.f32 %v707_v27, %v706_v20  ;;  %872 = vpow2.f32 %v219_v0  ;;  %v709_v29 = vsel %vm176_vm1, %v692_v51, 0.0  ;;  %v1488_v1 = vpop.eup %860 }
 0x125   :  { %v609_v34 = vadd.f32 %v608_v13, %v607_v56  ;;  %874 = vlog2.f32 %v222_v45  ;;  %v693_v24 = vmul.f32 %v1265_v28, %v520_v37  ;;  %v593_v63 = vmul.f32 %v1242_v41, %v523_v62  ;;  %v1495_v28 = vpop.eup %862 }
 0x126   :  { %v610_v18 = vsel %vm176_vm1, %v592_v8, 0.0  ;;  %v710_v40 = vadd.f32 %v709_v29, %v708_v35  ;;  %876 = vpow2.f32 %v287_v9  ;;  %v694_v54 = vmul.f32 %v1283_v57, %v523_v62 }
 0x127   :  { %v526_v48 = vpop.xlane.xlu0 %525  ;;  %v611_v23 = vadd.f32 %v610_v18, %v609_v34  ;;  %878 = vlog2.f32 %v290_v31  ;;  %v711_v43 = vsel %vm176_vm1, %v693_v24, 0.0  ;;  %v612_v36 = vsel %vm176_vm1, %v593_v63, 0.0 }
 0x128   :  { %v594_v56 = vmul.f32 %v1258_v47, %v526_v48  ;;  %v695_v35 = vmul.f32 %v1311_v14, %v526_v48  ;;  %v712_v41 = vadd.f32 %v711_v43, %v710_v40  ;;  %v713_v0 = vsel %vm176_vm1, %v694_v54, 0.0 }
 0x129   :  { %v613_v38 = vadd.f32 %v612_v36, %v611_v23  ;;  %v174_v20 = vmul.f32 %v1464_v12, %v1419_v7  ;;  %v865_v19 = vpop.eup %864  ;;  %880 = vlog2.f32 %v289_v53  ;;  %v595_v62 = vmul.f32 %v1272_v52, %v529_v44  ;;  %v535_v53 = vpop.xlane.xlu1 %534 }
 0x12a   :  { %v614_v47 = vsel %vm176_vm1, %v594_v56, 0.0  ;;  %v715_v57 = vsel %vm176_vm1, %v695_v35, 0.0  ;;  %v223_v13 = vadd.f32 1.0, %v865_v19  ;;  %v357_v14 = vmul.f32 1.442695, %v351_v16  ;;  %v867_v27 = vpop.eup %866 }
 0x12b   :  { %v532_v45 = vpop.xlane.xlu0 %531  ;;  %v714_v37 = vadd.f32 %v713_v0, %v712_v41  ;;  %v615_v9 = vadd.f32 %v614_v47, %v613_v38  ;;  %v359_v51 = vmul.f32 1.442695, %v352_v6  ;;  %v616_v8 = vsel %vm176_vm1, %v595_v62, 0.0  ;;  %v1679_v41 = vld [vmem:[#allocation6_spill] sm:$0xff] }
 0x12c   :  { %v696_v31 = vmul.f32 %v1326_v21, %v529_v44  ;;  %v596_v12 = vmul.f32 %v1303_v5, %v532_v45  ;;  %v869_v34 = vpop.eup %868  ;;  %882 = vlog2.f32 %v223_v13  ;;  %v291_v29 = vadd.f32 1.0, %v867_v27 }
 0x12d   :  { %v716_v18 = vadd.f32 %v715_v57, %v714_v37  ;;  %v617_v40 = vadd.f32 %v616_v8, %v615_v9  ;;  %v167_v52 = vmul.f32 0.6931472, %v869_v34  ;;  %v697_v63 = vmul.f32 %v1331_v22, %v532_v45  ;;  %v541_v19 = vpop.xlane.xlu1 %540  ;;  %v1681_v9 = vld [vmem:[#allocation8_spill] sm:$0xff] }
 0x12e   :  { %v717_v24 = vsel %vm176_vm1, %v696_v31, 0.0  ;;  %v618_v16 = vsel %vm176_vm1, %v596_v12, 0.0  ;;  %884 = vlog2.f32 %v291_v29  ;;  %v179_v21 = vadd.f32 %v1457_v2, %v1454_v49  ;;  %v871_v36 = vpop.eup %870  ;;  %v1680_v2 = vld [vmem:[#allocation5_spill] sm:$0xff] }
 0x12f   :  { %v538_v6 = vpop.xlane.xlu0 %537  ;;  %v619_v48 = vadd.f32 %v618_v16, %v617_v40  ;;  %v597_v5 = vmul.f32 %v1336_v25, %v535_v53  ;;  %v1678_v44 = vmin.f32 %v1319_v17, 0.0  ;;  %v718_v54 = vadd.f32 %v717_v24, %v716_v18  ;;  %v1682_v18 = vld [vmem:[#allocation9_spill] sm:$0xff] }
 0x130   :  { %v180_v56 = vsel %vm176_vm1, %v174_v20, 0.0  ;;  %v598_v43 = vmul.f32 %v1358_v46, %v538_v6  ;;  %886 = vpow2.f32 %v357_v14  ;;  %v719_v22 = vsel %vm176_vm1, %v697_v63, 0.0 }
 0x131   :  { %v171_v23 = vsub.f32 %v1678_v44, %v167_v52  ;;  %v620_v35 = vsel %vm176_vm1, %v597_v5, 0.0  ;;  %v698_v38 = vmul.f32 %v1679_v41, %v535_v53  ;;  %v873_v49 = vpop.eup %872  ;;  %v269_v0 = vmin.f32 %v1680_v2, 0.0  ;;  %v547_v5 = vpop.xlane.xlu1 %546 }
 0x132   :  { %888 = vpow2.f32 %v359_v51  ;;  %v621_v25 = vadd.f32 %v620_v35, %v619_v48  ;;  %v875_v47 = vpop.eup %874  ;;  %v202_v20 = vmin.f32 %v1379_v58, 0.0  ;;  %v224_v46 = vadd.f32 1.0, %v873_v49 }
 0x133   :  { %v175_v17 = vmul.f32 %v171_v23, %v1439_v11  ;;  %v181_v57 = vadd.f32 %v180_v56, %v179_v21  ;;  %v622_v62 = vsel %vm176_vm1, %v598_v43, 0.0  ;;  %v877_v45 = vpop.eup %876  ;;  %v361_v13 = vadd.f32 1.0, %v1488_v1  ;;  %v544_v51 = vpop.xlane.xlu0 %543 }
 0x134   :  { %v720_v37 = vadd.f32 %v719_v22, %v718_v54  ;;  %v699_v27 = vmul.f32 %v1681_v9, %v538_v6  ;;  %v879_v8 = vpop.eup %878  ;;  %890 = vlog2.f32 %v224_v46  ;;  %v292_v31 = vadd.f32 1.0, %v877_v45 }
 0x135   :  { %v182_v14 = vsel %vm176_vm1, %v175_v17, 0.0  ;;  %v721_v53 = vsel %vm176_vm1, %v698_v38, 0.0  ;;  %v226_v58 = vmul.f32 0.6931472, %v871_v36  ;;  %v362_v34 = vadd.f32 1.0, %v1495_v28  ;;  %v1536_v28 = vld [vmem:[%s1656_s5 + $0x60] sm:$0xff] }
 0x136   :  { %v183_v12 = vadd.f32 %v182_v14, %v181_v57  ;;  %v623_v29 = vadd.f32 %v622_v62, %v621_v25  ;;  %v599_v40 = vmul.f32 %v1682_v18, %v541_v19  ;;  %v881_v52 = vpop.eup %880  ;;  %v228_v1 = vmul.f32 0.6931472, %v875_v47  ;;  %v1684_v14 = vld [vmem:[#allocation10_spill] sm:$0xff] }
 0x137   :  { %v270_v24 = vmin.f32 %v1381_v59, 0.0  ;;  %892 = vlog2.f32 %v292_v31  ;;  %v600_v16 = vmul.f32 %v1401_v42, %v544_v51  ;;  %v296_v63 = vmul.f32 0.6931472, %v879_v8  ;;  %v1544_v42 = vld [vmem:[%s1657_s6 + $0x60] sm:$0xff]  ;;  %v550_v22 = vpop.xlane.xlu0 %549 }
 0x138   :  { %184 = vadd.xlane.f32.xlu1 %v183_v12  ;;  %v203_v6 = vmin.f32 %v1411_v55, 0.0  ;;  %v722_v21 = vadd.f32 %v721_v53, %v720_v37  ;;  %v624_v48 = vsel %vm176_vm1, %v599_v40, 0.0  ;;  %894 = vlog2.f32 %v361_v13 }
 0x139   :  { %v271_v44 = vmin.f32 %v1413_v33, 0.0  ;;  %v723_v59 = vsel %vm176_vm1, %v699_v27, 0.0  ;;  %v700_v23 = vmul.f32 %v1396_v39, %v541_v19  ;;  %v883_v55 = vpop.eup %882  ;;  %v1683_v54 = vmin.f32 %v1276_v30, 0.0  ;;  %v1551_v33 = vld [vmem:[%s1656_s5 + $0x68] sm:$0xff] }
 0x13a   :  { %v294_v43 = vmul.f32 0.6931472, %v881_v52  ;;  %896 = vlog2.f32 %v362_v34  ;;  %v625_v36 = vadd.f32 %v624_v48, %v623_v29  ;;  %v234_v35 = vsub.f32 %v202_v20, %v228_v1 }
 0x13b   :  { %v233_v56 = vsub.f32 %v1683_v54, %v226_v58  ;;  %v230_v39 = vmul.f32 0.6931472, %v883_v55  ;;  %v626_v41 = vsel %vm176_vm1, %v600_v16, 0.0  ;;  %v601_v38 = vmul.f32 %v1536_v28, %v547_v5  ;;  %v885_v49 = vpop.eup %884 }
 0x13c   :  { %v302_v17 = vsub.f32 %v270_v24, %v296_v63  ;;  %v724_v25 = vadd.f32 %v723_v59, %v722_v21  ;;  %v701_v30 = vmul.f32 %v1424_v61, %v544_v51  ;;  %v702_v19 = vmul.f32 %v1544_v42, %v547_v5  ;;  %v1566_v61 = vld [vmem:[%s1657_s6 + $0x68] sm:$0xff] }
 0x13d   :  { %v235_v47 = vsub.f32 %v203_v6, %v230_v39  ;;  %v298_v46 = vmul.f32 0.6931472, %v885_v49  ;;  %v725_v57 = vsel %vm176_vm1, %v700_v23, 0.0  ;;  %v602_v62 = vmul.f32 %v1551_v33, %v550_v22  ;;  %v887_v45 = vpop.eup %886  ;;  %v556_v6 = vpop.xlane.xlu0 %555 }
 0x13e   :  { %v204_v20 = vmin.f32 %v1459_v4, 0.0  ;;  %v272_v13 = vmin.f32 %v1461_v10, 0.0  ;;  %v764_v37 = vadd.f32 %v1684_v14, %v1447_v26  ;;  %v627_v9 = vadd.f32 %v626_v41, %v625_v36  ;;  %v1574_v4 = vld [vmem:[%s1656_s5 + $0x70] sm:$0xff]  ;;  %v553_v10 = vpop.xlane.xlu1 %552 }
 0x13f   :  { %v889_v27 = vpop.eup %888  ;;  %v301_v51 = vsub.f32 %v269_v0, %v294_v43  ;;  %v303_v8 = vsub.f32 %v271_v44, %v298_v46  ;;  %v628_v31 = vsel %vm176_vm1, %v601_v38, 0.0  ;;  %v238_v26 = vmul.f32 %v234_v35, %v1290_v60 }
 0x140   :  { %v726_v12 = vadd.f32 %v725_v57, %v724_v25  ;;  %v727_v53 = vsel %vm176_vm1, %v701_v30, 0.0  ;;  %v1685_v58 = vsub.f32 1.0, %v1290_v60  ;;  %v237_v2 = vmul.f32 %v233_v56, %v1295_v32  ;;  %v1589_v60 = vld [vmem:[%s1656_s5 + $0x78] sm:$0xff] }
 0x141   :  { %v729_v0 = vsel %vm176_vm1, %v702_v19, 0.0  ;;  %v630_v29 = vsel %vm176_vm1, %v602_v62, 0.0  ;;  %v703_v18 = vmul.f32 %v1566_v61, %v550_v22  ;;  %v239_v40 = vmul.f32 %v235_v47, %v1419_v7  ;;  %v891_v52 = vpop.eup %890 }
 0x142   :  { %v306_v34 = vmul.f32 %v302_v17, %v1685_v58  ;;  %v629_v1 = vadd.f32 %v628_v31, %v627_v9  ;;  %v603_v24 = vmul.f32 %v1574_v4, %v553_v10  ;;  %v363_v16 = vadd.f32 1.0, %v887_v45  ;;  %v1689_v58 = vld [vmem:[#allocation11_spill] sm:$0xff] }
 0x143   :  { %v364_v63 = vadd.f32 1.0, %v889_v27  ;;  %v1686_v21 = vsub.f32 1.0, %v1295_v32  ;;  %v1687_v5 = vsub.f32 1.0, %v1419_v7  ;;  %v232_v59 = vmul.f32 0.6931472, %v891_v52  ;;  %v1602_v7 = vld [vmem:[%s1657_s6 + $0x70] sm:$0xff] }
 0x144   :  { %v242_v23 = vsel %vm176_vm1, %v238_v26, 0.0  ;;  %v893_v55 = vpop.eup %892  ;;  %v728_v54 = vadd.f32 %v727_v53, %v726_v12  ;;  %v310_v56 = vsel %vm176_vm1, %v306_v34, 0.0  ;;  %v241_v43 = vsel %vm176_vm1, %v237_v2, 0.0  ;;  %v1690_v52 = vld [vmem:[#allocation7_spill] sm:$0xff] }
 0x145   :  { %v305_v48 = vmul.f32 %v301_v51, %v1686_v21  ;;  %v307_v44 = vmul.f32 %v303_v8, %v1687_v5  ;;  %898 = vlog2.f32 %v363_v16  ;;  %v300_v36 = vmul.f32 0.6931472, %v893_v55  ;;  %v895_v32 = vpop.eup %894  ;;  %v588_v51 = vld [vmem:[%s1657_s6 + $0x78] sm:$0xff] }
 0x146   :  { %v236_v22 = vsub.f32 %v204_v20, %v232_v59  ;;  %v244_v35 = vsel %vm176_vm1, %v239_v40, 0.0  ;;  %900 = vlog2.f32 %v364_v63  ;;  %v631_v39 = vadd.f32 %v630_v29, %v629_v1  ;;  %v1692_v59 = vld [vmem:[#allocation13_spill] sm:$0xff] }
 0x147   :  { %v632_v41 = vsel %vm176_vm1, %v603_v24, 0.0  ;;  %v604_v38 = vmul.f32 %v1589_v60, %v556_v6  ;;  %v243_v49 = vadd.f32 %v242_v23, %v241_v43  ;;  %v897_v17 = vpop.eup %896  ;;  %v304_v25 = vsub.f32 %v272_v13, %v300_v36  ;;  %v1691_v24 = vld [vmem:[#allocation12_spill] sm:$0xff]  ;;  %v1693_v36 = vld [vmem:[#allocation14_spill] sm:$0xff] }
 0x148   :  { %v309_v30 = vsel %vm176_vm1, %v305_v48, 0.0  ;;  %v312_v19 = vsel %vm176_vm1, %v307_v44, 0.0  ;;  %v240_v47 = vmul.f32 %v236_v22, %v1439_v11  ;;  %v668_v46 = vsel %vm176_vm1, %v1536_v28, 0.0 }
 0x149   :  { %v730_v57 = vadd.f32 %v729_v0, %v728_v54  ;;  %v311_v62 = vadd.f32 %v310_v56, %v309_v30  ;;  %v245_v45 = vadd.f32 %v244_v35, %v243_v49  ;;  %v731_v20 = vsel %vm176_vm1, %v703_v18, 0.0 }
 0x14a   :  { %v704_v14 = vmul.f32 %v1602_v7, %v553_v10  ;;  %v1688_v9 = vsub.f32 1.0, %v1439_v11  ;;  %v246_v13 = vsel %vm176_vm1, %v240_v47, 0.0  ;;  %v368_v26 = vmul.f32 0.6931472, %v897_v17 }
 0x14b   :  { %v313_v8 = vadd.f32 %v312_v19, %v311_v62  ;;  %v247_v31 = vadd.f32 %v246_v13, %v245_v45  ;;  %v633_v28 = vadd.f32 %v632_v41, %v631_v39  ;;  %v766_v12 = vadd.f32 %v1405_v15, %v764_v37 }
 0x14c   :  { %v308_v27 = vmul.f32 %v304_v25, %v1688_v9  ;;  %v667_v53 = vadd.f32 %v1409_v3, %v1441_v50  ;;  %v634_v11 = vsel %vm176_vm1, %v604_v38, 0.0  ;;  %v342_v34 = vmin.f32 %v1689_v58, 0.0 }
 0x14d   :  { %v732_v2 = vadd.f32 %v731_v20, %v730_v57  ;;  %248 = vadd.xlane.f32.xlu0 %v247_v31  ;;  %v366_v29 = vmul.f32 0.6931472, %v895_v32  ;;  %v733_v18 = vsel %vm176_vm1, %v704_v14, 0.0  ;;  %v705_v40 = vmul.f32 %v588_v51, %v556_v6 }
 0x14e   :  { %v314_v10 = vsel %vm176_vm1, %v308_v27, 0.0  ;;  %v341_v1 = vmin.f32 %v1690_v52, 0.0  ;;  %v374_v15 = vsub.f32 %v342_v34, %v368_v26  ;;  %v635_v37 = vadd.f32 %v634_v11, %v633_v28 }
 0x14f   :  { %v315_v0 = vadd.f32 %v314_v10, %v313_v8  ;;  %v768_v3 = vadd.f32 %v1691_v24, %v766_v12  ;;  %v669_v50 = vadd.f32 %v668_v46, %v667_v53  ;;  %v769_v16 = vsel %vm176_vm1, %v1544_v42, 0.0 }
 0x150   :  { %v670_v63 = vsel %vm176_vm1, %v1551_v33, 0.0  ;;  %v373_v21 = vsub.f32 %v341_v1, %v366_v29  ;;  %v734_v48 = vadd.f32 %v733_v18, %v732_v2  ;;  %v735_v44 = vsel %vm176_vm1, %v705_v40, 0.0 }
 0x151   :  { %316 = vadd.xlane.f32.xlu1 %v315_v0  ;;  %v343_v23 = vmin.f32 %v1692_v59, 0.0  ;;  %v771_v55 = vsel %vm176_vm1, %v1566_v61, 0.0  ;;  %v378_v56 = vsel %vm176_vm1, %v374_v15, 0.0  ;;  %v770_v43 = vadd.f32 %v769_v16, %v768_v3 }
 0x152   :  { %v899_v5 = vpop.eup %898  ;;  %v671_v42 = vadd.f32 %v670_v63, %v669_v50  ;;  %v344_v22 = vmin.f32 %v1693_v36, 0.0  ;;  %v672_v35 = vsel %vm176_vm1, %v1574_v4, 0.0  ;;  %v377_v39 = vsel %vm176_vm1, %v373_v21, 0.0 }
 0x153   :  { %v901_v6 = vpop.eup %900  ;;  %v370_v54 = vmul.f32 0.6931472, %v899_v5  ;;  %v736_v41 = vadd.f32 %v735_v44, %v734_v48  ;;  %v379_v49 = vadd.f32 %v378_v56, %v377_v39  ;;  %v772_v17 = vadd.f32 %v771_v55, %v770_v43 }
 0x154   :  { %v372_v33 = vmul.f32 0.6931472, %v901_v6  ;;  %v673_v19 = vadd.f32 %v672_v35, %v671_v42  ;;  %v773_v47 = vsel %vm176_vm1, %v1602_v7, 0.0  ;;  %v674_v4 = vsel %vm176_vm1, %v1589_v60, 0.0 }
 0x155   :  { %636 = vadd.xlane.f32.xlu1 %v635_v37  ;;  %v375_v32 = vsub.f32 %v343_v23, %v370_v54  ;;  %v774_v62 = vadd.f32 %v773_v47, %v772_v17  ;;  %v775_v45 = vsel %vm176_vm1, %v588_v51, 0.0 }
 0x156   :  { %v376_v38 = vsub.f32 %v344_v22, %v372_v33  ;;  %v675_v57 = vadd.f32 %v674_v4, %v673_v19 }
 0x157   :  { %v380_v61 = vsel %vm176_vm1, %v375_v32, 0.0  ;;  %v776_v20 = vadd.f32 %v775_v45, %v774_v62 }
 0x158   :  { %v381_v25 = vadd.f32 %v380_v61, %v379_v49  ;;  %v382_v30 = vsel %vm176_vm1, %v376_v38, 0.0 }
 0x159   :  { %737 = vadd.xlane.f32.xlu1 %v736_v41 }
 0x15a   :  { %v383_v46 = vadd.f32 %v382_v30, %v381_v25 }
 0x15c   :  { %384 = vadd.xlane.f32.xlu0 %v383_v46 }
 0x160   :  { %676 = vadd.xlane.f32.xlu0 %v675_v57 }
 0x164   :  { %777 = vadd.xlane.f32.xlu0 %v776_v20 }
 0x1c1   :  { %v185_v14 = vpop.xlane.xlu1 %184 }
 0x1c2   :  { %v186_v9 = vrot.slane %v185_v14, 4 }
 0x1c4   :  { %v187_v27 = vadd.f32 %v186_v9, %v185_v14 }
 0x1c6   :  { %v188_v13 = vrot.slane %v187_v27, 2 }
 0x1c8   :  { %v189_v8 = vadd.f32 %v188_v13, %v187_v27 }
 0x1ca   :  { %v190_v31 = vrot.slane %v189_v8, 1 }
 0x1cc   :  { %v191_v26 = vadd.f32 %v190_v31, %v189_v8 }
 0x1ce   :  { %816 = vpush %v191_v26 }
 0x1d6   :  { %v249_v7 = vpop.xlane.xlu0 %248 }
 0x1d7   :  { %v250_v28 = vrot.slane %v249_v7, 4 }
 0x1d9   :  { %v251_v53 = vadd.f32 %v250_v28, %v249_v7 }
 0x1da   :  { %v317_v60 = vpop.xlane.xlu1 %316 }
 0x1db   :  { %v318_v12 = vrot.slane %v317_v60, 4  ;;  %v252_v11 = vrot.slane %v251_v53, 2 }
 0x1dd   :  { %v319_v10 = vadd.f32 %v318_v12, %v317_v60  ;;  %v253_v2 = vadd.f32 %v252_v11, %v251_v53 }
 0x1de   :  { %v637_v58 = vpop.xlane.xlu1 %636 }
 0x1df   :  { %v320_v51 = vrot.slane %v319_v10, 2  ;;  %v638_v34 = vrot.slane %v637_v58, 4  ;;  %v254_v29 = vrot.slane %v253_v2, 1 }
 0x1e1   :  { %v639_v0 = vadd.f32 %v638_v34, %v637_v58  ;;  %v321_v18 = vadd.f32 %v320_v51, %v319_v10  ;;  %v255_v40 = vadd.f32 %v254_v29, %v253_v2 }
 0x1e2   :  { %v738_v42 = vpop.xlane.xlu1 %737 }
 0x1e3   :  { %v322_v52 = vrot.slane %v321_v18, 1  ;;  %v640_v1 = vrot.slane %v639_v0, 2  ;;  %818 = vpush %v255_v40  ;;  %v739_v22 = vrot.slane %v738_v42, 4 }
 0x1e5   :  { %v323_v15 = vadd.f32 %v322_v52, %v321_v18  ;;  %v385_v37 = vpop.xlane.xlu0 %384  ;;  %v641_v3 = vadd.f32 %v640_v1, %v639_v0  ;;  %v740_v35 = vadd.f32 %v739_v22, %v738_v42 }
 0x1e6   :  { %v386_v24 = vrot.slane %v385_v37, 4 }
 0x1e7   :  { %820 = vpush %v323_v15  ;;  %v642_v48 = vrot.slane %v641_v3, 1  ;;  %v741_v41 = vrot.slane %v740_v35, 2 }
 0x1e8   :  { %v387_v50 = vadd.f32 %v386_v24, %v385_v37 }
 0x1e9   :  { %v677_v16 = vpop.xlane.xlu0 %676  ;;  %v643_v23 = vadd.f32 %v642_v48, %v641_v3  ;;  %v742_v49 = vadd.f32 %v741_v41, %v740_v35 }
 0x1ea   :  { %v388_v63 = vrot.slane %v387_v50, 2  ;;  %v678_v21 = vrot.slane %v677_v16, 4 }
 0x1eb   :  { %v743_v17 = vrot.slane %v742_v49, 1 }
 0x1ec   :  { %v679_v5 = vadd.f32 %v678_v21, %v677_v16  ;;  %v389_v44 = vadd.f32 %v388_v63, %v387_v50 }
 0x1ed   :  { %v778_v36 = vpop.xlane.xlu0 %777  ;;  %v744_v19 = vadd.f32 %v743_v17, %v742_v49 }
 0x1ee   :  { %v680_v6 = vrot.slane %v679_v5, 2  ;;  %v390_v59 = vrot.slane %v389_v44, 1  ;;  %v779_v33 = vrot.slane %v778_v36, 4 }
 0x1f0   :  { %v391_v55 = vadd.f32 %v390_v59, %v389_v44  ;;  %v681_v54 = vadd.f32 %v680_v6, %v679_v5  ;;  %v780_v32 = vadd.f32 %v779_v33, %v778_v36 }
 0x1f2   :  { %822 = vpush %v391_v55  ;;  %v682_v56 = vrot.slane %v681_v54, 1  ;;  %v781_v38 = vrot.slane %v780_v32, 2 }
 0x1f3   :  { %824 = vpush %v643_v23 }
 0x1f4   :  { %v683_v43 = vadd.f32 %v682_v56, %v681_v54  ;;  %v782_v61 = vadd.f32 %v781_v38, %v780_v32 }
 0x1f6   :  { %826 = vpush %v683_v43  ;;  %v783_v25 = vrot.slane %v782_v61, 1 }
 0x1f8   :  { %v784_v47 = vadd.f32 %v783_v25, %v782_v61 }
 0x1ff   :  { %s817_s6 = spop %816 }
 0x200   :  { %s193_s22 = ssub.f32 0.0, %s817_s6 }
 0x202   :  { %s196_s23 = smul.f32 0.03125, %s193_s22 }
 0x204   :  { %792 = sst [smem:[#allocation2]] %s196_s23 }
 0x214   :  { %s819_s24 = spop %818 }
 0x215   :  { %s257_s25 = ssub.f32 0.0, %s819_s24 }
 0x217   :  { %s260_s26 = smul.f32 0.03125, %s257_s25 }
 0x218   :  { %s821_s0 = spop %820 }
 0x219   :  { %s327_s2 = smul.f32 0.03125, %s821_s0 }
 0x21b   :  { %s328_s27 = ssub.f32 %s260_s26, %s327_s2 }
 0x21d   :  { %794 = sst [smem:[#allocation2 + $0x1]] %s328_s27 }
 0x223   :  { %s823_s1 = spop %822 }
 0x224   :  { %s393_s28 = ssub.f32 0.0, %s823_s1  ;;  %s825_s4 = spop %824 }
 0x226   :  { %s396_s29 = smul.f32 0.03125, %s393_s28 }
 0x227   :  { %s827_s13 = spop %826 }
 0x228   :  { %796 = sst [smem:[#allocation2 + $0x2]] %s396_s29  ;;  %s685_s3 = smul.f32 64.0, %s827_s13 }
 0x22a   :  { %v686_v39 = vstv %s685_s3 }
 0x22b   :  { %902 = vrcp.f32 %v686_v39 }
 0x238   :  { %v903_v30 = vpop.eup %902 }
 0x239   :  { %828 = vpush %v903_v30 }
 0x23a   :  { %830 = vpush %v744_v19 }
 0x23b   :  { %832 = vpush %v784_v47 }
 0x26a   :  { %s829_s30 = spop %828 }
 0x26b   :  { %s689_s8 = smul.f32 %s829_s30, %s825_s4  ;;  %s831_s9 = spop %830 }
 0x26c   :  { %s833_s10 = spop %832 }
 0x26d   :  { %798 = sst [smem:[#allocation2 + $0x3]] %s689_s8  ;;  %s786_s11 = smul.f32 64.0, %s833_s10 }
 0x26f   :  { %v787_v4 = vstv %s786_s11 }
 0x270   :  { %904 = vrcp.f32 %v787_v4 }
 0x27d   :  { %v905_v46 = vpop.eup %904 }
 0x27e   :  { %834 = vpush %v905_v46 }
 0x2af   :  { %s835_s16 = spop %834 }
 0x2b0   :  { %s790_s17 = smul.f32 %s835_s16, %s831_s9 }
 0x2b2   :  { %800 = sst [smem:[#allocation2 + $0x4]] %s790_s17 }
 0x2b3   :  { %917 = shalt.err (!%p914_p4)
}
 0x2b4   :  { %s921_s5 = smov [#allocation2]  }
 0x2b5   :  { %810 = dma.smem_to_vmem %s921_s5, 16, %s808_s15, [#allocation3]  }
 0x2b6   :  { %918 = dma.done.wait [#allocation3], 16  }
 0x2b7   :  { %919 = vsyncadd [#allocation3], 4294967280 }
 0x2b8   :  { %814 = sfence }
 0x2b9   :  { %815 = vsyncpa [#allocation3], 1 }

</bundles_post_ra>
